<compile_context>
chip_gen: v7x
topology: tpu7x:2x2x1
jax: 0.10.0
libtpu: 0.0.40
codegen_flags: <defaults>
</compile_context>

<pallas_src>
import functools

import jax
import jax.numpy as jnp
from jax.experimental import pallas as pl
from jax.experimental.pallas import tpu as pltpu


def _dwconv_kernel(x_ref, w_ref, b_ref, out_ref, *,
                   tc, mult, kh, kw, ho, wo, has_bias):
    """One grid step = one (batch, input-channel-group) tile.

    x_ref  : VMEM (1, tc, Hp, Wp)        padded input channels of this group
    w_ref  : SMEM (CoutT*kh*kw,) f32     flat weights, row-major (out_ch, kh, kw)
    b_ref  : SMEM (CoutT,) f32           bias (zeros when bias=False)
    out_ref: VMEM (1, tc*mult, Ho, Wo)   depthwise conv output for this group
    """
    g = pl.program_id(1)            # which input-channel group
    kk = kh * kw
    for c in range(tc):             # local input channel (static unroll)
        # Load the kh*kw shifted windows of this input channel ONCE and reuse
        # them for every output channel derived from it (channel multiplier).
        windows = [[x_ref[0, c, i:i + ho, j:j + wo].astype(jnp.float32)
                    for j in range(kw)] for i in range(kh)]
        for m in range(mult):       # channel multiplier (= out_channels*depth / in_channels)
            og = (g * tc + c) * mult + m        # global output channel (traced scalar)
            wbase = og * kk                      # scalar-ALU offset, computed once
            if has_bias:
                acc = jnp.zeros((ho, wo), jnp.float32) + b_ref[og]
            else:
                acc = w_ref[wbase] * windows[0][0]
            for i in range(kh):
                for j in range(kw):
                    if (not has_bias) and i == 0 and j == 0:
                        continue                # already in acc
                    acc = acc + w_ref[wbase + i * kw + j] * windows[i][j]
            out_ref[0, c * mult + m] = acc.astype(out_ref.dtype)


def depthwise_conv2d(x, weight, bias=None, *, padding=(0, 0), channel_tile=None):
    """Forward of DepthwiseConv2d: Conv2d(Cin, CoutT, k, padding, groups=Cin).

    x:      (B, Cin, H, W) float32 (NCHW, like PyTorch)
    weight: (CoutT, 1, kh, kw) float32 with CoutT = out_channels * depth,
            CoutT % Cin == 0 (grouped-conv requirement)
    bias:   (CoutT,) float32 or None (module default bias=False)
    returns (B, CoutT, Ho, Wo) float32
    """
    B, Cin, H, W = x.shape
    CoutT, wcin, kh, kw = weight.shape
    assert wcin == 1, "groups == in_channels => 1 input channel per filter"
    assert CoutT % Cin == 0, "out_channels*depth must be divisible by in_channels"
    mult = CoutT // Cin
    if isinstance(padding, int):
        padding = (padding, padding)
    ph, pw = padding

    # stride = dilation = 1 (nn.Conv2d defaults; the module does not expose them)
    Ho = H + 2 * ph - (kh - 1)
    Wo = W + 2 * pw - (kw - 1)
    Hp, Wp = H + 2 * ph, W + 2 * pw

    # Glue: only a zero-pad of the input (no im2col, no transposes).
    xp = jnp.pad(x, ((0, 0), (0, 0), (ph, ph), (pw, pw)))

    w_flat = weight.reshape(CoutT * kh * kw).astype(jnp.float32)
    has_bias = bias is not None
    b_flat = (bias if has_bias
              else jnp.zeros((CoutT,), jnp.float32)).astype(jnp.float32)

    if channel_tile is None:
        channel_tile = Cin
    tc = channel_tile
    assert Cin % tc == 0
    grid = (B, Cin // tc)

    kernel = functools.partial(_dwconv_kernel, tc=tc, mult=mult,
                               kh=kh, kw=kw, ho=Ho, wo=Wo, has_bias=has_bias)

    out = pl.pallas_call(
        kernel,
        out_shape=jax.ShapeDtypeStruct((B, CoutT, Ho, Wo), x.dtype),
        grid_spec=pltpu.PrefetchScalarGridSpec(
            num_scalar_prefetch=0,
            grid=grid,
            in_specs=[
                # padded input: one batch, one channel group; (Hp, Wp) full-extent
                pl.BlockSpec((1, tc, Hp, Wp), lambda b, g: (b, g, 0, 0)),
                # tiny weight / bias tables live whole in SMEM (scalar splats)
                pl.BlockSpec(memory_space=pltpu.MemorySpace.SMEM),
                pl.BlockSpec(memory_space=pltpu.MemorySpace.SMEM),
            ],
            out_specs=pl.BlockSpec((1, tc * mult, Ho, Wo),
                                   lambda b, g: (b, g, 0, 0)),
        ),
        compiler_params=pltpu.CompilerParams(
            dimension_semantics=("parallel", "parallel")),
    )(xp, w_flat, b_flat)
    return out


def _reference(x, weight, bias=None, *, padding, groups):
    """Pure-JAX reference: grouped conv via lax.conv_general_dilated."""
    out = jax.lax.conv_general_dilated(
        x, weight, window_strides=(1, 1),
        padding=[(padding[0], padding[0]), (padding[1], padding[1])],
        dimension_numbers=("NCHW", "OIHW", "NCHW"),
        feature_group_count=groups)
    if bias is not None:
        out = out + bias.reshape(1, -1, 1, 1)
    return out


if __name__ == "__main__":
    key = jax.random.PRNGKey(0)
    kx, kwt = jax.random.split(key, 2)

    # DepthwiseConv2d(in_channels=4, out_channels=4, kernel_size=3, depth=2,
    #                 padding=1, bias=False) -> Conv2d(4, 8, 3, padding=1, groups=4)
    B, Cin, H, W = 2, 4, 16, 128          # W = 128 -> lane-dense output stores
    out_channels, depth, ksz, pad = 4, 2, 3, 1
    CoutT = out_channels * depth          # 8 conv filters, channel multiplier = 2

    x = jax.random.normal(kx, (B, Cin, H, W), dtype=jnp.float32)
    fan_in = ksz * ksz
    weight = jax.random.normal(kwt, (CoutT, 1, ksz, ksz),
                               dtype=jnp.float32) / jnp.sqrt(fan_in)

    out = depthwise_conv2d(x, weight, bias=None,
                           padding=(pad, pad), channel_tile=2)
    out = jax.block_until_ready(out)

    ref = _reference(x, weight, padding=(pad, pad), groups=Cin)
    assert out.shape == ref.shape, (out.shape, ref.shape)
    assert jnp.allclose(out, ref, atol=1e-5, rtol=1e-5)

    print("KERNEL_OK")
</pallas_src>

<mosaic_0001>
module attributes {stable_mosaic.version = 11 : i64} {
  func.func @_dwconv_kernel(%arg0: i32, %arg1: i32, %arg2: memref<1x2x18x130xf32, #tpu.memory_space<vmem>>, %arg3: memref<72xf32, #tpu.memory_space<smem>>, %arg4: memref<8xf32, #tpu.memory_space<smem>>, %arg5: memref<1x4x16x128xf32, #tpu.memory_space<vmem>>) attributes {dimension_semantics = [#tpu.dimension_semantics<parallel>, #tpu.dimension_semantics<parallel>], iteration_bounds = array<i64: 2, 2>, scalar_prefetch = 0 : i64, scratch_operands = 0 : i64, tpu.core_type = #tpu.core_type<tc>, window_params = [{transform_indices = @transform_0, window_bounds = array<i64: 1, 2, 18, 130>}, {transform_indices = @transform_1, window_bounds = array<i64: 72>}, {transform_indices = @transform_2, window_bounds = array<i64: 8>}, {transform_indices = @transform_3, window_bounds = array<i64: 1, 4, 16, 128>}]} {
    %c0 = arith.constant 0 : index
    %c0_0 = arith.constant 0 : index
    %c0_1 = arith.constant 0 : index
    %c0_2 = arith.constant 0 : index
    %0 = vector.load %arg2[%c0, %c0_0, %c0_1, %c0_2] : memref<1x2x18x130xf32, #tpu.memory_space<vmem>>, vector<1x1x16x128xf32>
    %1 = vector.shape_cast %0 : vector<1x1x16x128xf32> to vector<16x128xf32>
    %c0_3 = arith.constant 0 : index
    %c0_4 = arith.constant 0 : index
    %c0_5 = arith.constant 0 : index
    %c1 = arith.constant 1 : index
    %2 = vector.load %arg2[%c0_3, %c0_4, %c0_5, %c1] : memref<1x2x18x130xf32, #tpu.memory_space<vmem>>, vector<1x1x16x128xf32>
    %3 = vector.shape_cast %2 : vector<1x1x16x128xf32> to vector<16x128xf32>
    %c0_6 = arith.constant 0 : index
    %c0_7 = arith.constant 0 : index
    %c0_8 = arith.constant 0 : index
    %c2 = arith.constant 2 : index
    %4 = vector.load %arg2[%c0_6, %c0_7, %c0_8, %c2] : memref<1x2x18x130xf32, #tpu.memory_space<vmem>>, vector<1x1x16x128xf32>
    %5 = vector.shape_cast %4 : vector<1x1x16x128xf32> to vector<16x128xf32>
    %c0_9 = arith.constant 0 : index
    %c0_10 = arith.constant 0 : index
    %c1_11 = arith.constant 1 : index
    %c0_12 = arith.constant 0 : index
    %6 = vector.load %arg2[%c0_9, %c0_10, %c1_11, %c0_12] : memref<1x2x18x130xf32, #tpu.memory_space<vmem>>, vector<1x1x16x128xf32>
    %7 = vector.shape_cast %6 : vector<1x1x16x128xf32> to vector<16x128xf32>
    %c0_13 = arith.constant 0 : index
    %c0_14 = arith.constant 0 : index
    %c1_15 = arith.constant 1 : index
    %c1_16 = arith.constant 1 : index
    %8 = vector.load %arg2[%c0_13, %c0_14, %c1_15, %c1_16] : memref<1x2x18x130xf32, #tpu.memory_space<vmem>>, vector<1x1x16x128xf32>
    %9 = vector.shape_cast %8 : vector<1x1x16x128xf32> to vector<16x128xf32>
    %c0_17 = arith.constant 0 : index
    %c0_18 = arith.constant 0 : index
    %c1_19 = arith.constant 1 : index
    %c2_20 = arith.constant 2 : index
    %10 = vector.load %arg2[%c0_17, %c0_18, %c1_19, %c2_20] : memref<1x2x18x130xf32, #tpu.memory_space<vmem>>, vector<1x1x16x128xf32>
    %11 = vector.shape_cast %10 : vector<1x1x16x128xf32> to vector<16x128xf32>
    %c0_21 = arith.constant 0 : index
    %c0_22 = arith.constant 0 : index
    %c2_23 = arith.constant 2 : index
    %c0_24 = arith.constant 0 : index
    %12 = vector.load %arg2[%c0_21, %c0_22, %c2_23, %c0_24] : memref<1x2x18x130xf32, #tpu.memory_space<vmem>>, vector<1x1x16x128xf32>
    %13 = vector.shape_cast %12 : vector<1x1x16x128xf32> to vector<16x128xf32>
    %c0_25 = arith.constant 0 : index
    %c0_26 = arith.constant 0 : index
    %c2_27 = arith.constant 2 : index
    %c1_28 = arith.constant 1 : index
    %14 = vector.load %arg2[%c0_25, %c0_26, %c2_27, %c1_28] : memref<1x2x18x130xf32, #tpu.memory_space<vmem>>, vector<1x1x16x128xf32>
    %15 = vector.shape_cast %14 : vector<1x1x16x128xf32> to vector<16x128xf32>
    %c0_29 = arith.constant 0 : index
    %c0_30 = arith.constant 0 : index
    %c2_31 = arith.constant 2 : index
    %c2_32 = arith.constant 2 : index
    %16 = vector.load %arg2[%c0_29, %c0_30, %c2_31, %c2_32] : memref<1x2x18x130xf32, #tpu.memory_space<vmem>>, vector<1x1x16x128xf32>
    %17 = vector.shape_cast %16 : vector<1x1x16x128xf32> to vector<16x128xf32>
    %c2_i32 = arith.constant 2 : i32
    %18 = arith.muli %arg1, %c2_i32 : i32
    %c0_i32 = arith.constant 0 : i32
    %19 = arith.addi %18, %c0_i32 : i32
    %c2_i32_33 = arith.constant 2 : i32
    %20 = arith.muli %19, %c2_i32_33 : i32
    %c0_i32_34 = arith.constant 0 : i32
    %21 = arith.addi %20, %c0_i32_34 : i32
    %c9_i32 = arith.constant 9 : i32
    %22 = arith.muli %21, %c9_i32 : i32
    %23 = arith.index_cast %22 : i32 to index
    %24 = memref.load %arg3[%23] : memref<72xf32, #tpu.memory_space<smem>>
    %25 = vector.broadcast %24 : f32 to vector<16x128xf32>
    %26 = arith.mulf %25, %1 : vector<16x128xf32>
    %c0_i32_35 = arith.constant 0 : i32
    %27 = arith.addi %22, %c0_i32_35 : i32
    %c1_i32 = arith.constant 1 : i32
    %28 = arith.addi %27, %c1_i32 : i32
    %29 = arith.index_cast %28 : i32 to index
    %30 = memref.load %arg3[%29] : memref<72xf32, #tpu.memory_space<smem>>
    %31 = vector.broadcast %30 : f32 to vector<16x128xf32>
    %32 = arith.mulf %31, %3 : vector<16x128xf32>
    %33 = arith.addf %26, %32 : vector<16x128xf32>
    %c0_i32_36 = arith.constant 0 : i32
    %34 = arith.addi %22, %c0_i32_36 : i32
    %c2_i32_37 = arith.constant 2 : i32
    %35 = arith.addi %34, %c2_i32_37 : i32
    %36 = arith.index_cast %35 : i32 to index
    %37 = memref.load %arg3[%36] : memref<72xf32, #tpu.memory_space<smem>>
    %38 = vector.broadcast %37 : f32 to vector<16x128xf32>
    %39 = arith.mulf %38, %5 : vector<16x128xf32>
    %40 = arith.addf %33, %39 : vector<16x128xf32>
    %c3_i32 = arith.constant 3 : i32
    %41 = arith.addi %22, %c3_i32 : i32
    %c0_i32_38 = arith.constant 0 : i32
    %42 = arith.addi %41, %c0_i32_38 : i32
    %43 = arith.index_cast %42 : i32 to index
    %44 = memref.load %arg3[%43] : memref<72xf32, #tpu.memory_space<smem>>
    %45 = vector.broadcast %44 : f32 to vector<16x128xf32>
    %46 = arith.mulf %45, %7 : vector<16x128xf32>
    %47 = arith.addf %40, %46 : vector<16x128xf32>
    %c3_i32_39 = arith.constant 3 : i32
    %48 = arith.addi %22, %c3_i32_39 : i32
    %c1_i32_40 = arith.constant 1 : i32
    %49 = arith.addi %48, %c1_i32_40 : i32
    %50 = arith.index_cast %49 : i32 to index
    %51 = memref.load %arg3[%50] : memref<72xf32, #tpu.memory_space<smem>>
    %52 = vector.broadcast %51 : f32 to vector<16x128xf32>
    %53 = arith.mulf %52, %9 : vector<16x128xf32>
    %54 = arith.addf %47, %53 : vector<16x128xf32>
    %c3_i32_41 = arith.constant 3 : i32
    %55 = arith.addi %22, %c3_i32_41 : i32
    %c2_i32_42 = arith.constant 2 : i32
    %56 = arith.addi %55, %c2_i32_42 : i32
    %57 = arith.index_cast %56 : i32 to index
    %58 = memref.load %arg3[%57] : memref<72xf32, #tpu.memory_space<smem>>
    %59 = vector.broadcast %58 : f32 to vector<16x128xf32>
    %60 = arith.mulf %59, %11 : vector<16x128xf32>
    %61 = arith.addf %54, %60 : vector<16x128xf32>
    %c6_i32 = arith.constant 6 : i32
    %62 = arith.addi %22, %c6_i32 : i32
    %c0_i32_43 = arith.constant 0 : i32
    %63 = arith.addi %62, %c0_i32_43 : i32
    %64 = arith.index_cast %63 : i32 to index
    %65 = memref.load %arg3[%64] : memref<72xf32, #tpu.memory_space<smem>>
    %66 = vector.broadcast %65 : f32 to vector<16x128xf32>
    %67 = arith.mulf %66, %13 : vector<16x128xf32>
    %68 = arith.addf %61, %67 : vector<16x128xf32>
    %c6_i32_44 = arith.constant 6 : i32
    %69 = arith.addi %22, %c6_i32_44 : i32
    %c1_i32_45 = arith.constant 1 : i32
    %70 = arith.addi %69, %c1_i32_45 : i32
    %71 = arith.index_cast %70 : i32 to index
    %72 = memref.load %arg3[%71] : memref<72xf32, #tpu.memory_space<smem>>
    %73 = vector.broadcast %72 : f32 to vector<16x128xf32>
    %74 = arith.mulf %73, %15 : vector<16x128xf32>
    %75 = arith.addf %68, %74 : vector<16x128xf32>
    %c6_i32_46 = arith.constant 6 : i32
    %76 = arith.addi %22, %c6_i32_46 : i32
    %c2_i32_47 = arith.constant 2 : i32
    %77 = arith.addi %76, %c2_i32_47 : i32
    %78 = arith.index_cast %77 : i32 to index
    %79 = memref.load %arg3[%78] : memref<72xf32, #tpu.memory_space<smem>>
    %80 = vector.broadcast %79 : f32 to vector<16x128xf32>
    %81 = arith.mulf %80, %17 : vector<16x128xf32>
    %82 = arith.addf %75, %81 : vector<16x128xf32>
    %c0_48 = arith.constant 0 : index
    %c0_49 = arith.constant 0 : index
    %c0_50 = arith.constant 0 : index
    %c0_51 = arith.constant 0 : index
    %83 = vector.load %arg5[%c0_48, %c0_49, %c0_50, %c0_51] : memref<1x4x16x128xf32, #tpu.memory_space<vmem>>, vector<1x1x16x128xf32>
    %84 = vector.shape_cast %83 : vector<1x1x16x128xf32> to vector<16x128xf32>
    %85 = vector.shape_cast %82 : vector<16x128xf32> to vector<1x1x16x128xf32>
    tpu.vector_store %arg5[%c0_48, %c0_49, %c0_50, %c0_51], %85 {strides = array<i32>} : memref<1x4x16x128xf32, #tpu.memory_space<vmem>>, vector<1x1x16x128xf32>,
    %c2_i32_52 = arith.constant 2 : i32
    %86 = arith.muli %arg1, %c2_i32_52 : i32
    %c0_i32_53 = arith.constant 0 : i32
    %87 = arith.addi %86, %c0_i32_53 : i32
    %c2_i32_54 = arith.constant 2 : i32
    %88 = arith.muli %87, %c2_i32_54 : i32
    %c1_i32_55 = arith.constant 1 : i32
    %89 = arith.addi %88, %c1_i32_55 : i32
    %c9_i32_56 = arith.constant 9 : i32
    %90 = arith.muli %89, %c9_i32_56 : i32
    %91 = arith.index_cast %90 : i32 to index
    %92 = memref.load %arg3[%91] : memref<72xf32, #tpu.memory_space<smem>>
    %93 = vector.broadcast %92 : f32 to vector<16x128xf32>
    %94 = arith.mulf %93, %1 : vector<16x128xf32>
    %c0_i32_57 = arith.constant 0 : i32
    %95 = arith.addi %90, %c0_i32_57 : i32
    %c1_i32_58 = arith.constant 1 : i32
    %96 = arith.addi %95, %c1_i32_58 : i32
    %97 = arith.index_cast %96 : i32 to index
    %98 = memref.load %arg3[%97] : memref<72xf32, #tpu.memory_space<smem>>
    %99 = vector.broadcast %98 : f32 to vector<16x128xf32>
    %100 = arith.mulf %99, %3 : vector<16x128xf32>
    %101 = arith.addf %94, %100 : vector<16x128xf32>
    %c0_i32_59 = arith.constant 0 : i32
    %102 = arith.addi %90, %c0_i32_59 : i32
    %c2_i32_60 = arith.constant 2 : i32
    %103 = arith.addi %102, %c2_i32_60 : i32
    %104 = arith.index_cast %103 : i32 to index
    %105 = memref.load %arg3[%104] : memref<72xf32, #tpu.memory_space<smem>>
    %106 = vector.broadcast %105 : f32 to vector<16x128xf32>
    %107 = arith.mulf %106, %5 : vector<16x128xf32>
    %108 = arith.addf %101, %107 : vector<16x128xf32>
    %c3_i32_61 = arith.constant 3 : i32
    %109 = arith.addi %90, %c3_i32_61 : i32
    %c0_i32_62 = arith.constant 0 : i32
    %110 = arith.addi %109, %c0_i32_62 : i32
    %111 = arith.index_cast %110 : i32 to index
    %112 = memref.load %arg3[%111] : memref<72xf32, #tpu.memory_space<smem>>
    %113 = vector.broadcast %112 : f32 to vector<16x128xf32>
    %114 = arith.mulf %113, %7 : vector<16x128xf32>
    %115 = arith.addf %108, %114 : vector<16x128xf32>
    %c3_i32_63 = arith.constant 3 : i32
    %116 = arith.addi %90, %c3_i32_63 : i32
    %c1_i32_64 = arith.constant 1 : i32
    %117 = arith.addi %116, %c1_i32_64 : i32
    %118 = arith.index_cast %117 : i32 to index
    %119 = memref.load %arg3[%118] : memref<72xf32, #tpu.memory_space<smem>>
    %120 = vector.broadcast %119 : f32 to vector<16x128xf32>
    %121 = arith.mulf %120, %9 : vector<16x128xf32>
    %122 = arith.addf %115, %121 : vector<16x128xf32>
    %c3_i32_65 = arith.constant 3 : i32
    %123 = arith.addi %90, %c3_i32_65 : i32
    %c2_i32_66 = arith.constant 2 : i32
    %124 = arith.addi %123, %c2_i32_66 : i32
    %125 = arith.index_cast %124 : i32 to index
    %126 = memref.load %arg3[%125] : memref<72xf32, #tpu.memory_space<smem>>
    %127 = vector.broadcast %126 : f32 to vector<16x128xf32>
    %128 = arith.mulf %127, %11 : vector<16x128xf32>
    %129 = arith.addf %122, %128 : vector<16x128xf32>
    %c6_i32_67 = arith.constant 6 : i32
    %130 = arith.addi %90, %c6_i32_67 : i32
    %c0_i32_68 = arith.constant 0 : i32
    %131 = arith.addi %130, %c0_i32_68 : i32
    %132 = arith.index_cast %131 : i32 to index
    %133 = memref.load %arg3[%132] : memref<72xf32, #tpu.memory_space<smem>>
    %134 = vector.broadcast %133 : f32 to vector<16x128xf32>
    %135 = arith.mulf %134, %13 : vector<16x128xf32>
    %136 = arith.addf %129, %135 : vector<16x128xf32>
    %c6_i32_69 = arith.constant 6 : i32
    %137 = arith.addi %90, %c6_i32_69 : i32
    %c1_i32_70 = arith.constant 1 : i32
    %138 = arith.addi %137, %c1_i32_70 : i32
    %139 = arith.index_cast %138 : i32 to index
    %140 = memref.load %arg3[%139] : memref<72xf32, #tpu.memory_space<smem>>
    %141 = vector.broadcast %140 : f32 to vector<16x128xf32>
    %142 = arith.mulf %141, %15 : vector<16x128xf32>
    %143 = arith.addf %136, %142 : vector<16x128xf32>
    %c6_i32_71 = arith.constant 6 : i32
    %144 = arith.addi %90, %c6_i32_71 : i32
    %c2_i32_72 = arith.constant 2 : i32
    %145 = arith.addi %144, %c2_i32_72 : i32
    %146 = arith.index_cast %145 : i32 to index
    %147 = memref.load %arg3[%146] : memref<72xf32, #tpu.memory_space<smem>>
    %148 = vector.broadcast %147 : f32 to vector<16x128xf32>
    %149 = arith.mulf %148, %17 : vector<16x128xf32>
    %150 = arith.addf %143, %149 : vector<16x128xf32>
    %c0_73 = arith.constant 0 : index
    %c1_74 = arith.constant 1 : index
    %c0_75 = arith.constant 0 : index
    %c0_76 = arith.constant 0 : index
    %151 = vector.load %arg5[%c0_73, %c1_74, %c0_75, %c0_76] : memref<1x4x16x128xf32, #tpu.memory_space<vmem>>, vector<1x1x16x128xf32>
    %152 = vector.shape_cast %151 : vector<1x1x16x128xf32> to vector<16x128xf32>
    %153 = vector.shape_cast %150 : vector<16x128xf32> to vector<1x1x16x128xf32>
    tpu.vector_store %arg5[%c0_73, %c1_74, %c0_75, %c0_76], %153 {strides = array<i32>} : memref<1x4x16x128xf32, #tpu.memory_space<vmem>>, vector<1x1x16x128xf32>,
    %c0_77 = arith.constant 0 : index
    %c1_78 = arith.constant 1 : index
    %c0_79 = arith.constant 0 : index
    %c0_80 = arith.constant 0 : index
    %154 = vector.load %arg2[%c0_77, %c1_78, %c0_79, %c0_80] : memref<1x2x18x130xf32, #tpu.memory_space<vmem>>, vector<1x1x16x128xf32>
    %155 = vector.shape_cast %154 : vector<1x1x16x128xf32> to vector<16x128xf32>
    %c0_81 = arith.constant 0 : index
    %c1_82 = arith.constant 1 : index
    %c0_83 = arith.constant 0 : index
    %c1_84 = arith.constant 1 : index
    %156 = vector.load %arg2[%c0_81, %c1_82, %c0_83, %c1_84] : memref<1x2x18x130xf32, #tpu.memory_space<vmem>>, vector<1x1x16x128xf32>
    %157 = vector.shape_cast %156 : vector<1x1x16x128xf32> to vector<16x128xf32>
    %c0_85 = arith.constant 0 : index
    %c1_86 = arith.constant 1 : index
    %c0_87 = arith.constant 0 : index
    %c2_88 = arith.constant 2 : index
    %158 = vector.load %arg2[%c0_85, %c1_86, %c0_87, %c2_88] : memref<1x2x18x130xf32, #tpu.memory_space<vmem>>, vector<1x1x16x128xf32>
    %159 = vector.shape_cast %158 : vector<1x1x16x128xf32> to vector<16x128xf32>
    %c0_89 = arith.constant 0 : index
    %c1_90 = arith.constant 1 : index
    %c1_91 = arith.constant 1 : index
    %c0_92 = arith.constant 0 : index
    %160 = vector.load %arg2[%c0_89, %c1_90, %c1_91, %c0_92] : memref<1x2x18x130xf32, #tpu.memory_space<vmem>>, vector<1x1x16x128xf32>
    %161 = vector.shape_cast %160 : vector<1x1x16x128xf32> to vector<16x128xf32>
    %c0_93 = arith.constant 0 : index
    %c1_94 = arith.constant 1 : index
    %c1_95 = arith.constant 1 : index
    %c1_96 = arith.constant 1 : index
    %162 = vector.load %arg2[%c0_93, %c1_94, %c1_95, %c1_96] : memref<1x2x18x130xf32, #tpu.memory_space<vmem>>, vector<1x1x16x128xf32>
    %163 = vector.shape_cast %162 : vector<1x1x16x128xf32> to vector<16x128xf32>
    %c0_97 = arith.constant 0 : index
    %c1_98 = arith.constant 1 : index
    %c1_99 = arith.constant 1 : index
    %c2_100 = arith.constant 2 : index
    %164 = vector.load %arg2[%c0_97, %c1_98, %c1_99, %c2_100] : memref<1x2x18x130xf32, #tpu.memory_space<vmem>>, vector<1x1x16x128xf32>
    %165 = vector.shape_cast %164 : vector<1x1x16x128xf32> to vector<16x128xf32>
    %c0_101 = arith.constant 0 : index
    %c1_102 = arith.constant 1 : index
    %c2_103 = arith.constant 2 : index
    %c0_104 = arith.constant 0 : index
    %166 = vector.load %arg2[%c0_101, %c1_102, %c2_103, %c0_104] : memref<1x2x18x130xf32, #tpu.memory_space<vmem>>, vector<1x1x16x128xf32>
    %167 = vector.shape_cast %166 : vector<1x1x16x128xf32> to vector<16x128xf32>
    %c0_105 = arith.constant 0 : index
    %c1_106 = arith.constant 1 : index
    %c2_107 = arith.constant 2 : index
    %c1_108 = arith.constant 1 : index
    %168 = vector.load %arg2[%c0_105, %c1_106, %c2_107, %c1_108] : memref<1x2x18x130xf32, #tpu.memory_space<vmem>>, vector<1x1x16x128xf32>
    %169 = vector.shape_cast %168 : vector<1x1x16x128xf32> to vector<16x128xf32>
    %c0_109 = arith.constant 0 : index
    %c1_110 = arith.constant 1 : index
    %c2_111 = arith.constant 2 : index
    %c2_112 = arith.constant 2 : index
    %170 = vector.load %arg2[%c0_109, %c1_110, %c2_111, %c2_112] : memref<1x2x18x130xf32, #tpu.memory_space<vmem>>, vector<1x1x16x128xf32>
    %171 = vector.shape_cast %170 : vector<1x1x16x128xf32> to vector<16x128xf32>
    %c2_i32_113 = arith.constant 2 : i32
    %172 = arith.muli %arg1, %c2_i32_113 : i32
    %c1_i32_114 = arith.constant 1 : i32
    %173 = arith.addi %172, %c1_i32_114 : i32
    %c2_i32_115 = arith.constant 2 : i32
    %174 = arith.muli %173, %c2_i32_115 : i32
    %c0_i32_116 = arith.constant 0 : i32
    %175 = arith.addi %174, %c0_i32_116 : i32
    %c9_i32_117 = arith.constant 9 : i32
    %176 = arith.muli %175, %c9_i32_117 : i32
    %177 = arith.index_cast %176 : i32 to index
    %178 = memref.load %arg3[%177] : memref<72xf32, #tpu.memory_space<smem>>
    %179 = vector.broadcast %178 : f32 to vector<16x128xf32>
    %180 = arith.mulf %179, %155 : vector<16x128xf32>
    %c0_i32_118 = arith.constant 0 : i32
    %181 = arith.addi %176, %c0_i32_118 : i32
    %c1_i32_119 = arith.constant 1 : i32
    %182 = arith.addi %181, %c1_i32_119 : i32
    %183 = arith.index_cast %182 : i32 to index
    %184 = memref.load %arg3[%183] : memref<72xf32, #tpu.memory_space<smem>>
    %185 = vector.broadcast %184 : f32 to vector<16x128xf32>
    %186 = arith.mulf %185, %157 : vector<16x128xf32>
    %187 = arith.addf %180, %186 : vector<16x128xf32>
    %c0_i32_120 = arith.constant 0 : i32
    %188 = arith.addi %176, %c0_i32_120 : i32
    %c2_i32_121 = arith.constant 2 : i32
    %189 = arith.addi %188, %c2_i32_121 : i32
    %190 = arith.index_cast %189 : i32 to index
    %191 = memref.load %arg3[%190] : memref<72xf32, #tpu.memory_space<smem>>
    %192 = vector.broadcast %191 : f32 to vector<16x128xf32>
    %193 = arith.mulf %192, %159 : vector<16x128xf32>
    %194 = arith.addf %187, %193 : vector<16x128xf32>
    %c3_i32_122 = arith.constant 3 : i32
    %195 = arith.addi %176, %c3_i32_122 : i32
    %c0_i32_123 = arith.constant 0 : i32
    %196 = arith.addi %195, %c0_i32_123 : i32
    %197 = arith.index_cast %196 : i32 to index
    %198 = memref.load %arg3[%197] : memref<72xf32, #tpu.memory_space<smem>>
    %199 = vector.broadcast %198 : f32 to vector<16x128xf32>
    %200 = arith.mulf %199, %161 : vector<16x128xf32>
    %201 = arith.addf %194, %200 : vector<16x128xf32>
    %c3_i32_124 = arith.constant 3 : i32
    %202 = arith.addi %176, %c3_i32_124 : i32
    %c1_i32_125 = arith.constant 1 : i32
    %203 = arith.addi %202, %c1_i32_125 : i32
    %204 = arith.index_cast %203 : i32 to index
    %205 = memref.load %arg3[%204] : memref<72xf32, #tpu.memory_space<smem>>
    %206 = vector.broadcast %205 : f32 to vector<16x128xf32>
    %207 = arith.mulf %206, %163 : vector<16x128xf32>
    %208 = arith.addf %201, %207 : vector<16x128xf32>
    %c3_i32_126 = arith.constant 3 : i32
    %209 = arith.addi %176, %c3_i32_126 : i32
    %c2_i32_127 = arith.constant 2 : i32
    %210 = arith.addi %209, %c2_i32_127 : i32
    %211 = arith.index_cast %210 : i32 to index
    %212 = memref.load %arg3[%211] : memref<72xf32, #tpu.memory_space<smem>>
    %213 = vector.broadcast %212 : f32 to vector<16x128xf32>
    %214 = arith.mulf %213, %165 : vector<16x128xf32>
    %215 = arith.addf %208, %214 : vector<16x128xf32>
    %c6_i32_128 = arith.constant 6 : i32
    %216 = arith.addi %176, %c6_i32_128 : i32
    %c0_i32_129 = arith.constant 0 : i32
    %217 = arith.addi %216, %c0_i32_129 : i32
    %218 = arith.index_cast %217 : i32 to index
    %219 = memref.load %arg3[%218] : memref<72xf32, #tpu.memory_space<smem>>
    %220 = vector.broadcast %219 : f32 to vector<16x128xf32>
    %221 = arith.mulf %220, %167 : vector<16x128xf32>
    %222 = arith.addf %215, %221 : vector<16x128xf32>
    %c6_i32_130 = arith.constant 6 : i32
    %223 = arith.addi %176, %c6_i32_130 : i32
    %c1_i32_131 = arith.constant 1 : i32
    %224 = arith.addi %223, %c1_i32_131 : i32
    %225 = arith.index_cast %224 : i32 to index
    %226 = memref.load %arg3[%225] : memref<72xf32, #tpu.memory_space<smem>>
    %227 = vector.broadcast %226 : f32 to vector<16x128xf32>
    %228 = arith.mulf %227, %169 : vector<16x128xf32>
    %229 = arith.addf %222, %228 : vector<16x128xf32>
    %c6_i32_132 = arith.constant 6 : i32
    %230 = arith.addi %176, %c6_i32_132 : i32
    %c2_i32_133 = arith.constant 2 : i32
    %231 = arith.addi %230, %c2_i32_133 : i32
    %232 = arith.index_cast %231 : i32 to index
    %233 = memref.load %arg3[%232] : memref<72xf32, #tpu.memory_space<smem>>
    %234 = vector.broadcast %233 : f32 to vector<16x128xf32>
    %235 = arith.mulf %234, %171 : vector<16x128xf32>
    %236 = arith.addf %229, %235 : vector<16x128xf32>
    %c0_134 = arith.constant 0 : index
    %c2_135 = arith.constant 2 : index
    %c0_136 = arith.constant 0 : index
    %c0_137 = arith.constant 0 : index
    %237 = vector.load %arg5[%c0_134, %c2_135, %c0_136, %c0_137] : memref<1x4x16x128xf32, #tpu.memory_space<vmem>>, vector<1x1x16x128xf32>
    %238 = vector.shape_cast %237 : vector<1x1x16x128xf32> to vector<16x128xf32>
    %239 = vector.shape_cast %236 : vector<16x128xf32> to vector<1x1x16x128xf32>
    tpu.vector_store %arg5[%c0_134, %c2_135, %c0_136, %c0_137], %239 {strides = array<i32>} : memref<1x4x16x128xf32, #tpu.memory_space<vmem>>, vector<1x1x16x128xf32>,
    %c2_i32_138 = arith.constant 2 : i32
    %240 = arith.muli %arg1, %c2_i32_138 : i32
    %c1_i32_139 = arith.constant 1 : i32
    %241 = arith.addi %240, %c1_i32_139 : i32
    %c2_i32_140 = arith.constant 2 : i32
    %242 = arith.muli %241, %c2_i32_140 : i32
    %c1_i32_141 = arith.constant 1 : i32
    %243 = arith.addi %242, %c1_i32_141 : i32
    %c9_i32_142 = arith.constant 9 : i32
    %244 = arith.muli %243, %c9_i32_142 : i32
    %245 = arith.index_cast %244 : i32 to index
    %246 = memref.load %arg3[%245] : memref<72xf32, #tpu.memory_space<smem>>
    %247 = vector.broadcast %246 : f32 to vector<16x128xf32>
    %248 = arith.mulf %247, %155 : vector<16x128xf32>
    %c0_i32_143 = arith.constant 0 : i32
    %249 = arith.addi %244, %c0_i32_143 : i32
    %c1_i32_144 = arith.constant 1 : i32
    %250 = arith.addi %249, %c1_i32_144 : i32
    %251 = arith.index_cast %250 : i32 to index
    %252 = memref.load %arg3[%251] : memref<72xf32, #tpu.memory_space<smem>>
    %253 = vector.broadcast %252 : f32 to vector<16x128xf32>
    %254 = arith.mulf %253, %157 : vector<16x128xf32>
    %255 = arith.addf %248, %254 : vector<16x128xf32>
    %c0_i32_145 = arith.constant 0 : i32
    %256 = arith.addi %244, %c0_i32_145 : i32
    %c2_i32_146 = arith.constant 2 : i32
    %257 = arith.addi %256, %c2_i32_146 : i32
    %258 = arith.index_cast %257 : i32 to index
    %259 = memref.load %arg3[%258] : memref<72xf32, #tpu.memory_space<smem>>
    %260 = vector.broadcast %259 : f32 to vector<16x128xf32>
    %261 = arith.mulf %260, %159 : vector<16x128xf32>
    %262 = arith.addf %255, %261 : vector<16x128xf32>
    %c3_i32_147 = arith.constant 3 : i32
    %263 = arith.addi %244, %c3_i32_147 : i32
    %c0_i32_148 = arith.constant 0 : i32
    %264 = arith.addi %263, %c0_i32_148 : i32
    %265 = arith.index_cast %264 : i32 to index
    %266 = memref.load %arg3[%265] : memref<72xf32, #tpu.memory_space<smem>>
    %267 = vector.broadcast %266 : f32 to vector<16x128xf32>
    %268 = arith.mulf %267, %161 : vector<16x128xf32>
    %269 = arith.addf %262, %268 : vector<16x128xf32>
    %c3_i32_149 = arith.constant 3 : i32
    %270 = arith.addi %244, %c3_i32_149 : i32
    %c1_i32_150 = arith.constant 1 : i32
    %271 = arith.addi %270, %c1_i32_150 : i32
    %272 = arith.index_cast %271 : i32 to index
    %273 = memref.load %arg3[%272] : memref<72xf32, #tpu.memory_space<smem>>
    %274 = vector.broadcast %273 : f32 to vector<16x128xf32>
    %275 = arith.mulf %274, %163 : vector<16x128xf32>
    %276 = arith.addf %269, %275 : vector<16x128xf32>
    %c3_i32_151 = arith.constant 3 : i32
    %277 = arith.addi %244, %c3_i32_151 : i32
    %c2_i32_152 = arith.constant 2 : i32
    %278 = arith.addi %277, %c2_i32_152 : i32
    %279 = arith.index_cast %278 : i32 to index
    %280 = memref.load %arg3[%279] : memref<72xf32, #tpu.memory_space<smem>>
    %281 = vector.broadcast %280 : f32 to vector<16x128xf32>
    %282 = arith.mulf %281, %165 : vector<16x128xf32>
    %283 = arith.addf %276, %282 : vector<16x128xf32>
    %c6_i32_153 = arith.constant 6 : i32
    %284 = arith.addi %244, %c6_i32_153 : i32
    %c0_i32_154 = arith.constant 0 : i32
    %285 = arith.addi %284, %c0_i32_154 : i32
    %286 = arith.index_cast %285 : i32 to index
    %287 = memref.load %arg3[%286] : memref<72xf32, #tpu.memory_space<smem>>
    %288 = vector.broadcast %287 : f32 to vector<16x128xf32>
    %289 = arith.mulf %288, %167 : vector<16x128xf32>
    %290 = arith.addf %283, %289 : vector<16x128xf32>
    %c6_i32_155 = arith.constant 6 : i32
    %291 = arith.addi %244, %c6_i32_155 : i32
    %c1_i32_156 = arith.constant 1 : i32
    %292 = arith.addi %291, %c1_i32_156 : i32
    %293 = arith.index_cast %292 : i32 to index
    %294 = memref.load %arg3[%293] : memref<72xf32, #tpu.memory_space<smem>>
    %295 = vector.broadcast %294 : f32 to vector<16x128xf32>
    %296 = arith.mulf %295, %169 : vector<16x128xf32>
    %297 = arith.addf %290, %296 : vector<16x128xf32>
    %c6_i32_157 = arith.constant 6 : i32
    %298 = arith.addi %244, %c6_i32_157 : i32
    %c2_i32_158 = arith.constant 2 : i32
    %299 = arith.addi %298, %c2_i32_158 : i32
    %300 = arith.index_cast %299 : i32 to index
    %301 = memref.load %arg3[%300] : memref<72xf32, #tpu.memory_space<smem>>
    %302 = vector.broadcast %301 : f32 to vector<16x128xf32>
    %303 = arith.mulf %302, %171 : vector<16x128xf32>
    %304 = arith.addf %297, %303 : vector<16x128xf32>
    %c0_159 = arith.constant 0 : index
    %c3 = arith.constant 3 : index
    %c0_160 = arith.constant 0 : index
    %c0_161 = arith.constant 0 : index
    %305 = vector.load %arg5[%c0_159, %c3, %c0_160, %c0_161] : memref<1x4x16x128xf32, #tpu.memory_space<vmem>>, vector<1x1x16x128xf32>
    %306 = vector.shape_cast %305 : vector<1x1x16x128xf32> to vector<16x128xf32>
    %307 = vector.shape_cast %304 : vector<16x128xf32> to vector<1x1x16x128xf32>
    tpu.vector_store %arg5[%c0_159, %c3, %c0_160, %c0_161], %307 {strides = array<i32>} : memref<1x4x16x128xf32, #tpu.memory_space<vmem>>, vector<1x1x16x128xf32>,
    return
  }
  func.func @transform_0(%arg0: i32, %arg1: i32) -> (i32, i32, i32, i32) {
    %c0_i32 = arith.constant 0 : i32
    %c0_i32_0 = arith.constant 0 : i32
    %c0_i32_1 = arith.constant 0 : i32
    return %arg0, %arg1, %c0_i32, %c0_i32_0 : i32, i32, i32, i32
  }
  func.func @transform_1(%arg0: i32, %arg1: i32) -> i32 {
    %c0_i32 = arith.constant 0 : i32
    %c0_i32_0 = arith.constant 0 : i32
    return %c0_i32 : i32
  }
  func.func @transform_2(%arg0: i32, %arg1: i32) -> i32 {
    %c0_i32 = arith.constant 0 : i32
    %c0_i32_0 = arith.constant 0 : i32
    return %c0_i32 : i32
  }
  func.func @transform_3(%arg0: i32, %arg1: i32) -> (i32, i32, i32, i32) {
    %c0_i32 = arith.constant 0 : i32
    %c0_i32_0 = arith.constant 0 : i32
    %c0_i32_1 = arith.constant 0 : i32
    return %arg0, %arg1, %c0_i32, %c0_i32_0 : i32, i32, i32, i32
  }
}

</mosaic_0001>

<bundles_post_ra>
// kernel: tpu_custom_call.1
= control target key start
LH: loop header
LB: loop body
LE: loop exit
PB: predicated region body
PF: predicated region fallthrough
CT: control target
= control target key end

     0   :  { %s2577_s0 = inlined_call_operand.vmem [shape: f32[2,4,18,130], index: 0, kind: input, shape index: {}]   ;;  %s2578_s1 = inlined_call_operand.vmem [shape: f32[72], index: 1, kind: input, shape index: {}]   ;;  %s2579_s2 = inlined_call_operand.vmem [shape: f32[8], index: 2, kind: input, shape index: {}]   ;;  %s2580_s3 = inlined_call_operand.hbm [shape: f32[2,8,16,128], index: 3, kind: output, shape index: {}]  }
   0x1   :  { %2585 = sst [smem:[#allocation11_spill]] %s2578_s1 }
   0x2   :  { %2586 = sst [smem:[#allocation12_spill]] %s2579_s2 }
   0x3   :  { %8 = vsyncpa [#allocation4], 0 }
   0x4   :  { %9 = vsyncpa [#allocation6], 0 }
   0x5   :  { %10 = vsyncpa [#allocation3], 0 }
   0x6   :  { %12 = vsyncpa [#allocation3 + $0x1], 0  ;;  %s1697_s12 = smov 0   ;;  %s1699_s13 = smov 0  }
   0x7   :  { %s1701_s14 = smov 0   ;;  %s1703_s15 = smov 0  }
   0x8   :  { %s1705_s16 = smov 0   ;;  %s1707_s17 = smov 0  }
   0x9   :  { %s1709_s18 = smov 0   ;;  %s1711_s19 = smov 0  }
   0xa LB: > { %s1388_s20 = sadd.s32 4294967295, %s1668_s19   ;;  %s1389_s21 = sadd.s32 4294967294, %s1668_s19   ;;  %s1668_s19 = sphi %s1711_s19, %s18_s19   ;;  %s1664_s18 = sphi %s1709_s18, %s2604_s18   ;;  %s1660_s17 = sphi %s1707_s17, %s2603_s17   ;;  %s1656_s16 = sphi %s1705_s16, %s2602_s16   ;;  %s1652_s15 = sphi %s1703_s15, %s2601_s15   ;;  %s1648_s14 = sphi %s1701_s14, %s2600_s14   ;;  %s1644_s13 = sphi %s1699_s13, %s2599_s13   ;;  %s1640_s12 = sphi %s1697_s12, %s2598_s12  }
   0xb   : > { %s27_s22 = sadd.s32 1, %s1660_s17  ;;  %s30_s23 = sadd.s32 1, %s1664_s18 }
   0xc   : > { %p28_p0 = scmp.ge.s32.totalorder %s27_s22, 2  ;;  %s109_s24 = sadd.s32 1, %s1648_s14 }
   0xd   : > { %p119_p1 = scmp.ne.s32.totalorder %s1648_s14, %s1644_s13  ;;  %p120_p2 = scmp.eq.s32.totalorder %s1388_s20, 3 }
   0xe   : > { %s2606_s22 = smov (%p28_p0, %s27_s22), 0  ;;  %s2608_s23 = smov (!%p28_p0, %s30_s23), %s1664_s18 }
   0xf   : > { %s105_s25 = ssub.s32 %s1660_s17, %s2606_s22  ;;  %p1749_p3 = por %p120_p2, %p119_p1 }
  0x10   : > { %p32_p4 = scmp.ge.s32.totalorder %s2608_s23, 2  ;;  %p125_p5 = scmp.ne.s32.totalorder %s1644_s13, %s1640_s12 }
  0x11   : > { %s2587_s26 = scalar_select %p1749_p3, 1, 0 }
  0x12   : > { %p126_p6 = scmp.eq.s32.totalorder %s1389_s21, 3  ;;  %p1390_p7 = scmp.ge.s32.totalorder %s1668_s19, 1 }
  0x13   : > { %s2610_s23 = smov (%p32_p4, %s2608_s23), 0  ;;  %p133_p9 = scmp.lt.s32.totalorder %s1668_s19, 5 }
  0x14   : > { %p1758_p8 = por %p126_p6, %p125_p5  ;;  %s104_s28 = ssub.s32 %s1664_s18, %s2610_s23 }
  0x15   : > { %s106_s29 = sor.u32 %s105_s25, %s104_s28  ;;  %p1765_p10 = pnand %p1390_p7, %p133_p9 }
  0x16   : > { %s2588_s27 = scalar_select %p1758_p8, 1, 0 }
  0x17   : > { %s2589_s30 = scalar_select %p1765_p10, 1, 0 }
  0x18   : > { %p107_p11 = scmp.eq.s32.totalorder %s106_s29, 0  ;;  %p1769_p12 = scmp.eq.s32.totalorder %s1388_s20, 0 }
  0x19   : > { %p1444_p13 = pneg %p1765_p10  ;;  %s2591_s1 = sld [smem:[#allocation11_spill]] }
  0x1a   : > { %s2590_s4 = scalar_select %p1769_p12, 1, 0 }
  0x1b   : > { %s1779_s8 = scalar_select %p107_p11, %s1648_s14, %s109_s24  }
  0x1c   : > { %p1783_p0 = pnand %p1769_p12, %p1444_p13  ;;  %s2593_s2 = sld [smem:[#allocation12_spill]] }
  0x1e   : > { %p1538_p2 = pneg %p1783_p0 }
  0x1f   : > { %s146_s7 = sshll.u32 %s2591_s1, 4  ;;  %s147_s7 = int_to_ptr.vmem [resolvable:$true] %s146_s7 }
  0x20   : > { %s1536_s21 = scalar_lea.vmem %s147_s7, 16  ;;  %p1544_p6 = scmp.lt.s32.totalorder %s147_s7, %s147_s7 }
  0x21   : > { %p1537_p1 = scmp.ne.s32.totalorder %s147_s7, %s1536_s21  ;;  %p1545_p7 = scmp.lt.s32.totalorder %s1536_s21, %s1536_s21 }
  0x22   : > { %s157_s20 = sshll.u32 %s2593_s2, 4  ;;  %s158_s20 = int_to_ptr.vmem [resolvable:$true] %s157_s20 }
  0x23   : > { %p1539_p4 = pnand %p1538_p2, %p1537_p1  ;;  %p1546_p9 = por %p1545_p7, %p1544_p6 }
  0x25   : > { %p1540_p5 = pneg %p1539_p4 }
  0x27   : > { %p1547_p11 = pnand %p1546_p9, %p1540_p5 }
  0x29   : > { %1550 = shalt.err (!%p1547_p11)
}
  0x2a   : > { %s1670_s24 = smov [#allocation2]   ;;  %s1551_s25 = scalar_lea.vmem %s158_s20, 16 }
  0x2b   : > { %1447 = dma.vmem_to_smem (!%p1783_p0), %s147_s7, 16, %s1670_s24, [#allocation4]  }
  0x2c   : > { %p1552_p13 = scmp.ne.s32.totalorder %s158_s20, %s1551_s25  ;;  %p1559_p12 = scmp.lt.s32.totalorder %s158_s20, %s158_s20 }
  0x2d   : > { %p1560_p10 = scmp.lt.s32.totalorder %s1551_s25, %s1551_s25 }
  0x2e   : > { %p1554_p8 = pnand %p1552_p13, %p1538_p2 }
  0x2f   : > { %p1561_p1 = por %p1560_p10, %p1559_p12 }
  0x30   : > { %p1555_p3 = pneg %p1554_p8 }
  0x32   : > { %p1562_p4 = pnand %p1561_p1, %p1555_p3 }
  0x34   : > { %1565 = shalt.err (!%p1562_p4)
}
  0x35   : > { %s1671_s28 = smov [#allocation5]   ;;  %p2594_p5 = scmp.ne.s32.totalorder %s2589_s30, 0 }
  0x36   : > { %1450 = dma.vmem_to_smem (!%p1783_p0), %s158_s20, 16, %s1671_s28, [#allocation6]  }
  0x37   : > { %184 = sbr.rel (%p2594_p5) target bundleno = 402 (0x192), region = 32  ;;  %p2595_p6 = scmp.ne.s32.totalorder (!%p2594_p5), %s2590_s4, 0 }
  0x3e   : > { %1627 = dma.done.wait (%p2595_p6), [#allocation4], 16  }
  0x3f   : > { %1629 = vsyncadd (%p2595_p6), [#allocation4], 4294967280 }
  0x40   : > { %1631 = dma.done.wait (%p2595_p6), [#allocation6], 16  }
  0x41   : > { %1633 = vsyncadd (%p2595_p6), [#allocation6], 4294967280 }
  0x42   : > { %194 = sfence }
  0x43   : > { %s1807_s29 = sshll.u32 %s1652_s15, 1  ;;  %p219_p3 = scmp.lt.s32.totalorder %s1656_s16, 1  ;;  %vm308_vm0 = vcmask 1046528   ;;  %vm405_vm1 = vcmask 1045504   ;;  %vm266_vm2 = vcmask 1039360   ;;  %vm292_vm3 = vcmask 1031168  }
  0x44   : > { %p221_p8 = scmp.lt.s32.totalorder %s1807_s29, 3  ;;  %s1812_s30 = smul.u32 36, %s1652_s15 }
  0x45   : > { %s220_s5 = scalar_select %p219_p3, %s1656_s16, 1 }
  0x46   : > { %s222_s6 = scalar_select %p221_p8, %s1807_s29, 3 }
  0x47   : > { %s1433_s4 = smul.u32 24, %s220_s5  ;;  %s247_s7 = sadd.s32 1, %s1812_s30 }
  0x48   : > { %s1432_s9 = smul.u32 6, %s222_s6  ;;  %s248_s10 = sld [smem:[#allocation2 + %s247_s7]] }
  0x49   : > { %s273_s11 = sadd.s32 2, %s1812_s30  ;;  %s318_s2 = sadd.s32 4, %s1812_s30 }
  0x4a   : > { %s225_s20 = sadd.s32 %s1433_s4, %s1432_s9  ;;  %s274_s21 = sld [smem:[#allocation2 + %s273_s11]] }
  0x4b   : > { %s1399_s24 = sshll.u32 %s225_s20, 3  ;;  %s319_s5 = sld [smem:[#allocation2 + %s318_s2]] }
  0x4c   : > { %s1821_s1 = scalar_lea.vmem %s2577_s0, %s1399_s24  ;;  %s357_s6 = sadd.s32 5, %s1812_s30 }
  0x4d   : > { %v1825_v0 = vld [vmem:[%s1821_s1 + $0x10] sm:$0xff]  ;;  %v1828_v1 = vld [vmem:[%s1821_s1] sm:$0xff]  ;;  %v1831_v3 = vld [vmem:[%s1821_s1 + $0x18] sm:$0xff]  ;;  %s1672_s4 = smov 127   ;;  %s358_s2 = sld [smem:[#allocation2 + %s357_s6]] }
  0x4e   : > { %v249_v2 = vstv %s248_s10  ;;  %v1834_v4 = vld [vmem:[%s1821_s1 + $0x8] sm:$0xff]  ;;  %v1847_v12 = vld [vmem:[%s1821_s1] sm:$0xfe]  ;;  %v1861_v20 = vld [vmem:[%s1821_s1 + $0x20] sm:$0x1]  ;;  %s415_s7 = sadd.s32 7, %s1812_s30 }
  0x4f   : > { %v252_v5 = vmul.f32 %v249_v2, %v1825_v0  ;;  %v250_v6 = vmul.f32 %v249_v2, %v1828_v1  ;;  %v253_v7 = vmul.f32 %v249_v2, %v1831_v3  ;;  %v251_v8 = vmul.f32 %v249_v2, %v1834_v4  ;;  %v1844_v10 = vld [vmem:[%s1821_s1 + $0x8] sm:$0xfe]  ;;  %v1854_v15 = vld [vmem:[%s1821_s1 + $0x28] sm:$0x1]  ;;  %s1673_s9 = smov 126   ;;  %s416_s10 = sld [smem:[#allocation2 + %s415_s7]] }
  0x50   : > { %v275_v9 = vstv %s274_s21  ;;  %s454_s11 = sadd.s32 8, %s1812_s30  ;;  %v1886_v46 = vld [vmem:[%s1821_s1 + $0x8] sm:$0xfc]  ;;  %v1889_v48 = vld [vmem:[%s1821_s1] sm:$0xfc]  ;;  %s1400_s21 = sshll.u32 %s1652_s15, 2 }
  0x51   : > { %262 = vrot.lane.b32.xlu1 %v252_v5, %s1672_s4  ;;  %258 = vrot.lane.b32.xlu0 %v250_v6, %s1672_s4  ;;  %v320_v11 = vstv %s319_s5  ;;  %v277_v13 = vmul.f32 %v275_v9, %v1834_v4  ;;  %v276_v14 = vmul.f32 %v275_v9, %v1828_v1  ;;  %v279_v22 = vmul.f32 %v275_v9, %v1831_v3  ;;  %s455_s20 = sld [smem:[#allocation2 + %s454_s11]]  ;;  %v1901_v57 = vld [vmem:[%s1821_s1 + $0x28] sm:$0x3]  ;;  %s496_s24 = sadd.s32 1, %s1400_s21 }
  0x52   : > { %v322_v16 = vmul.f32 %v320_v11, %v1844_v10  ;;  %v324_v17 = vmul.f32 %v320_v11, %v1831_v3  ;;  %v321_v18 = vmul.f32 %v320_v11, %v1847_v12  ;;  %v323_v19 = vmul.f32 %v320_v11, %v1825_v0  ;;  %v1904_v58 = vld [vmem:[%s1821_s1 + $0x20] sm:$0x3]  ;;  %s1914_s25 = smul.u32 9, %s496_s24  ;;  %p2596_p12 = scmp.ne.s32.totalorder %s2587_s26, 0 }
  0x53   : > { %v326_v21 = vmul.f32 %v320_v11, %v1854_v15  ;;  %v278_v23 = vmul.f32 %v275_v9, %v1825_v0  ;;  %v325_v24 = vmul.f32 %v320_v11, %v1861_v20  ;;  %v359_v25 = vstv %s358_s2 }
  0x54   : > { %v336_v26 = vrot.slane %v322_v16, 1  ;;  %v337_v27 = vrot.slane %v324_v17, 1  ;;  %v333_v28 = vrot.slane %v321_v18, 1  ;;  %v334_v29 = vrot.slane %v323_v19, 1  ;;  %s502_s28 = sadd.s32 1, %s1914_s25  ;;  %s527_s6 = sadd.s32 2, %s1914_s25 }
  0x55   : > { %264 = vrot.lane.b32.xlu1 %v253_v7, %s1672_s4  ;;  %260 = vrot.lane.b32.xlu0 %v251_v8, %s1672_s4  ;;  %v341_v30 = vrot.slane %v326_v21, 1  ;;  %v339_v31 = vrot.slane %v325_v24, 1  ;;  %v361_v32 = vmul.f32 %v359_v25, %v1844_v10  ;;  %v363_v33 = vmul.f32 %v359_v25, %v1831_v3  ;;  %s503_s5 = sld [smem:[#allocation2 + %s502_s28]]  ;;  %s570_s2 = sadd.s32 4, %s1914_s25 }
  0x56   : > { %v338_v34 = vsel %vm308_vm0, %v336_v26, %v337_v27  ;;  %v335_v35 = vsel %vm308_vm0, %v333_v28, %v334_v29  ;;  %v360_v36 = vmul.f32 %v359_v25, %v1847_v12  ;;  %v362_v37 = vmul.f32 %v359_v25, %v1825_v0  ;;  %s528_s7 = sld [smem:[#allocation2 + %s527_s6]]  ;;  %s609_s11 = sadd.s32 5, %s1914_s25 }
  0x57   : > { %v342_v38 = vsel %vm308_vm0, %v337_v27, %v341_v30  ;;  %v375_v39 = vrot.slane %v361_v32, 1  ;;  %v376_v40 = vrot.slane %v363_v33, 1  ;;  %v365_v41 = vmul.f32 %v359_v25, %v1854_v15  ;;  %s666_s24 = sadd.s32 7, %s1914_s25  ;;  %s1429_s28 = sadd.s32 2, %s1400_s21 }
  0x58   : > { %v364_v42 = vmul.f32 %v359_v25, %v1861_v20  ;;  %v340_v43 = vsel %vm308_vm0, %v334_v29, %v339_v31  ;;  %v372_v44 = vrot.slane %v360_v36, 1  ;;  %v373_v45 = vrot.slane %v362_v37, 1  ;;  %s667_s6 = sld [smem:[#allocation2 + %s666_s24]] }
  0x59   : > { %286 = vrot.lane.b32.xlu1 %v277_v13, %s1673_s9  ;;  %284 = vrot.lane.b32.xlu0 %v276_v14, %s1673_s9  ;;  %v417_v47 = vstv %s416_s10  ;;  %v377_v49 = vsel %vm308_vm0, %v375_v39, %v376_v40  ;;  %v380_v50 = vrot.slane %v365_v41, 1  ;;  %v456_v59 = vstv %s455_s20  ;;  %s571_s10 = sld [smem:[#allocation2 + %s570_s2]]  ;;  %s1013_s2 = sadd.s32 1, %s1429_s28 }
  0x5a   : > { %v378_v51 = vrot.slane %v364_v42, 1  ;;  %v419_v52 = vmul.f32 %v417_v47, %v1886_v46  ;;  %v374_v53 = vsel %vm308_vm0, %v372_v44, %v373_v45  ;;  %v421_v54 = vmul.f32 %v417_v47, %v1831_v3  ;;  %s610_s20 = sld [smem:[#allocation2 + %s609_s11]]  ;;  %s1970_s21 = smul.u32 9, %s1013_s2 }
  0x5b   : > { %v418_v55 = vmul.f32 %v417_v47, %v1889_v48  ;;  %v420_v56 = vmul.f32 %v417_v47, %v1825_v0  ;;  %v381_v60 = vsel %vm308_vm0, %v376_v40, %v380_v50  ;;  %v423_v63 = vmul.f32 %v417_v47, %v1901_v57  ;;  %s705_s11 = sadd.s32 8, %s1914_s25 }
  0x5c   : > { %v379_v61 = vsel %vm308_vm0, %v373_v45, %v378_v51  ;;  %v433_v62 = vrot.slane %v419_v52, 2  ;;  %v434_v2 = vrot.slane %v421_v54, 2  ;;  %v422_v7 = vmul.f32 %v417_v47, %v1904_v58  ;;  %s706_s28 = sld [smem:[#allocation2 + %s705_s11]] }
  0x5d   : > { %290 = vrot.lane.b32.xlu1 %v279_v22, %s1673_s9  ;;  %288 = vrot.lane.b32.xlu0 %v278_v23, %s1673_s9  ;;  %v430_v5 = vrot.slane %v418_v55, 2  ;;  %v431_v6 = vrot.slane %v420_v56, 2  ;;  %v438_v8 = vrot.slane %v423_v63, 2  ;;  %v458_v9 = vmul.f32 %v456_v59, %v1886_v46 }
  0x5e   : > { %v460_v11 = vmul.f32 %v456_v59, %v1831_v3  ;;  %v457_v13 = vmul.f32 %v456_v59, %v1889_v48  ;;  %v435_v14 = vsel %vm405_vm1, %v433_v62, %v434_v2  ;;  %v436_v17 = vrot.slane %v422_v7, 2 }
  0x5f   : > { %v432_v16 = vsel %vm405_vm1, %v430_v5, %v431_v6  ;;  %v459_v18 = vmul.f32 %v456_v59, %v1825_v0  ;;  %v439_v19 = vsel %vm405_vm1, %v434_v2, %v438_v8  ;;  %v472_v21 = vrot.slane %v458_v9, 2 }
  0x60   : > { %v473_v22 = vrot.slane %v460_v11, 2  ;;  %v469_v23 = vrot.slane %v457_v13, 2  ;;  %v437_v24 = vsel %vm405_vm1, %v431_v6, %v436_v17  ;;  %v462_v26 = vmul.f32 %v456_v59, %v1901_v57 }
  0x61   : > { %345 = vrot.lane.b32.xlu1 %v338_v34, %s1672_s4  ;;  %343 = vrot.lane.b32.xlu0 %v335_v35, %s1672_s4  ;;  %v470_v25 = vrot.slane %v459_v18, 2  ;;  %v461_v27 = vmul.f32 %v456_v59, %v1904_v58  ;;  %v504_v34 = vstv %s503_s5  ;;  %v529_v39 = vstv %s528_s7  ;;  %s761_s5 = sadd.s32 1, %s1807_s29  ;;  %s1183_s7 = sadd.s32 7, %s1970_s21 }
  0x62   : > { %v474_v28 = vsel %vm405_vm1, %v472_v21, %v473_v22  ;;  %v477_v30 = vrot.slane %v462_v26, 2  ;;  %v506_v35 = vmul.f32 %v504_v34, %v1834_v4  ;;  %v505_v36 = vmul.f32 %v504_v34, %v1828_v1  ;;  %s1968_s29 = smul.u32 18, %s761_s5  ;;  %s1222_s5 = sadd.s32 8, %s1970_s21 }
  0x63   : > { %v471_v29 = vsel %vm405_vm1, %v469_v23, %v470_v25  ;;  %v475_v31 = vrot.slane %v461_v27, 2  ;;  %v508_v37 = vmul.f32 %v504_v34, %v1831_v3  ;;  %v572_v40 = vstv %s571_s10 }
  0x64   : > { %v478_v32 = vsel %vm405_vm1, %v473_v22, %v477_v30  ;;  %v531_v41 = vmul.f32 %v529_v39, %v1834_v4  ;;  %v530_v42 = vmul.f32 %v529_v39, %v1828_v1  ;;  %v576_v44 = vmul.f32 %v572_v40, %v1831_v3  ;;  %s970_s10 = sadd.s32 8, %s1968_s29  ;;  %v2001_v30 = vld [vmem:[%s1821_s1 + $0x48] sm:$0xff]  ;;  %s767_s2 = sadd.s32 1, %s1968_s29 }
  0x65   : > { %349 = vrot.lane.b32.xlu1 %v342_v38, %s1672_s4  ;;  %347 = vrot.lane.b32.xlu0 %v340_v43, %s1672_s4  ;;  %v476_v33 = vsel %vm405_vm1, %v470_v25, %v475_v31  ;;  %v507_v38 = vmul.f32 %v504_v34, %v1825_v0  ;;  %v574_v43 = vmul.f32 %v572_v40, %v1844_v10  ;;  %v611_v56 = vstv %s610_s20  ;;  %s1184_s20 = sld [smem:[#allocation2 + %s1183_s7]]  ;;  %v2004_v31 = vld [vmem:[%s1821_s1 + $0x38] sm:$0xfc]  ;;  %s835_s11 = sadd.s32 4, %s1968_s29 }
  0x66   : > { %v573_v45 = vmul.f32 %v572_v40, %v1847_v12  ;;  %v575_v47 = vmul.f32 %v572_v40, %v1825_v0  ;;  %v533_v4 = vmul.f32 %v529_v39, %v1831_v3  ;;  %v589_v51 = vrot.slane %v576_v44, 1  ;;  %s971_s24 = sld [smem:[#allocation2 + %s970_s10]]  ;;  %s792_s10 = sadd.s32 2, %s1968_s29 }
  0x67   : > { %v588_v50 = vrot.slane %v574_v43, 1  ;;  %v578_v52 = vmul.f32 %v572_v40, %v1854_v15  ;;  %v577_v55 = vmul.f32 %v572_v40, %v1861_v20  ;;  %v615_v62 = vmul.f32 %v611_v56, %v1831_v3  ;;  %s768_s7 = sld [smem:[#allocation2 + %s767_s2]] }
  0x68   : > { %v586_v54 = vrot.slane %v575_v47, 1  ;;  %v612_v5 = vmul.f32 %v611_v56, %v1847_v12  ;;  %v614_v6 = vmul.f32 %v611_v56, %v1825_v0  ;;  %v617_v7 = vmul.f32 %v611_v56, %v1854_v15 }
  0x69   : > { %384 = vrot.lane.b32.xlu1 %v377_v49, %s1673_s9  ;;  %382 = vrot.lane.b32.xlu0 %v374_v53, %s1673_s9  ;;  %v532_v49 = vmul.f32 %v529_v39, %v1825_v0  ;;  %v585_v53 = vrot.slane %v573_v45, 1  ;;  %v590_v59 = vsel %vm308_vm0, %v588_v50, %v589_v51  ;;  %v591_v2 = vrot.slane %v577_v55, 1 }
  0x6a   : > { %v668_v8 = vstv %s667_s6  ;;  %v616_v11 = vmul.f32 %v611_v56, %v1861_v20  ;;  %v625_v17 = vrot.slane %v614_v6, 1  ;;  %s2020_s6 = sld [smem:[#allocation2 + %s1222_s5]] }
  0x6b   : > { %v587_v63 = vsel %vm308_vm0, %v585_v53, %v586_v54  ;;  %v592_v13 = vsel %vm308_vm0, %v586_v54, %v591_v2  ;;  %v670_v15 = vmul.f32 %v668_v8, %v1886_v46  ;;  %v672_v18 = vmul.f32 %v668_v8, %v1831_v3 }
  0x6c   : > { %v630_v21 = vrot.slane %v616_v11, 1  ;;  %v671_v25 = vmul.f32 %v668_v8, %v1825_v0 }
  0x6d   : > { %388 = vrot.lane.b32.xlu1 %v381_v60, %s1673_s9  ;;  %386 = vrot.lane.b32.xlu0 %v379_v61, %s1673_s9  ;;  %v593_v60 = vrot.slane %v578_v52, 1  ;;  %v613_v61 = vmul.f32 %v611_v56, %v1844_v10  ;;  %v684_v26 = vrot.slane %v670_v15, 2  ;;  %v685_v27 = vrot.slane %v672_v18, 2 }
  0x6e   : > { %v631_v34 = vsel %vm308_vm0, %v625_v17, %v630_v21  ;;  %v682_v40 = vrot.slane %v671_v25, 2 }
  0x6f   : > { %v594_v10 = vsel %vm308_vm0, %v589_v51, %v593_v60  ;;  %v627_v9 = vrot.slane %v613_v61, 1  ;;  %v686_v43 = vsel %vm405_vm1, %v684_v26, %v685_v27 }
  0x71   : > { %442 = vrot.lane.b32.xlu1 %v435_v14, %s1672_s4  ;;  %440 = vrot.lane.b32.xlu0 %v432_v16, %s1672_s4  ;;  %v628_v14 = vrot.slane %v615_v62, 1  ;;  %v624_v16 = vrot.slane %v612_v5, 1 }
  0x73   : > { %v629_v22 = vsel %vm308_vm0, %v627_v9, %v628_v14  ;;  %v626_v23 = vsel %vm308_vm0, %v624_v16, %v625_v17 }
  0x75   : > { %446 = vrot.lane.b32.xlu1 %v439_v19, %s1672_s4  ;;  %444 = vrot.lane.b32.xlu0 %v437_v24, %s1672_s4  ;;  %v632_v19 = vrot.slane %v617_v7, 1  ;;  %v669_v24 = vmul.f32 %v668_v8, %v1889_v48 }
  0x77   : > { %v681_v39 = vrot.slane %v669_v24, 2 }
  0x79   : > { %481 = vrot.lane.b32.xlu1 %v474_v28, %s1673_s9  ;;  %479 = vrot.lane.b32.xlu0 %v471_v29, %s1673_s9  ;;  %v633_v28 = vsel %vm308_vm0, %v628_v14, %v632_v19  ;;  %v674_v29 = vmul.f32 %v668_v8, %v1901_v57  ;;  %v683_v56 = vsel %vm405_vm1, %v681_v39, %v682_v40  ;;  %v2094_v39 = vld [vmem:[%s1821_s1 + $0x40] sm:$0xff] }
  0x7d   : > { %485 = vrot.lane.b32.xlu1 %v478_v32, %s1673_s9  ;;  %483 = vrot.lane.b32.xlu0 %v476_v33, %s1673_s9  ;;  %v2006_v32 = vstv %s1184_s20  ;;  %v2008_v33 = vstv %s971_s24  ;;  %s793_s20 = sld [smem:[#allocation2 + %s792_s10]]  ;;  %s299_s10 = sadd.s32 3, %s1812_s30 }
  0x7e   : > { %v974_v47 = vmul.f32 %v2004_v31, %v2008_v33  ;;  %v976_v54 = vmul.f32 %v2001_v30, %v2008_v33  ;;  %s836_s24 = sld [smem:[#allocation2 + %s835_s11]] }
  0x80   : > { %v988_v55 = vrot.slane %v974_v47, 2  ;;  %v989_v60 = vrot.slane %v976_v54, 2 }
  0x81   : > { %515 = vrot.lane.b32.xlu1 %v506_v35, %s1672_s4  ;;  %513 = vrot.lane.b32.xlu0 %v505_v36, %s1672_s4  ;;  %v707_v35 = vstv %s706_s28  ;;  %v2014_v36 = vld [vmem:[%s1821_s1 + $0x58] sm:$0x3]  ;;  %s1019_s28 = sadd.s32 1, %s1970_s21 }
  0x82   : > { %v711_v50 = vmul.f32 %v707_v35, %v1831_v3  ;;  %v708_v52 = vmul.f32 %v707_v35, %v1889_v48  ;;  %v710_v3 = vmul.f32 %v707_v35, %v1825_v0  ;;  %v978_v2 = vmul.f32 %v2014_v36, %v2008_v33  ;;  %s1020_s5 = sld [smem:[#allocation2 + %s1019_s28]] }
  0x83   : > { %v2051_v7 = vsel %vm405_vm1, %v988_v55, %v989_v60 }
  0x84   : > { %v724_v5 = vrot.slane %v711_v50, 2  ;;  %v720_v6 = vrot.slane %v708_v52, 2  ;;  %v721_v9 = vrot.slane %v710_v3, 2  ;;  %v993_v11 = vrot.slane %v978_v2, 2 }
  0x85   : > { %519 = vrot.lane.b32.xlu1 %v508_v37, %s1672_s4  ;;  %517 = vrot.lane.b32.xlu0 %v507_v38, %s1672_s4  ;;  %v1187_v37 = vmul.f32 %v2004_v31, %v2006_v32  ;;  %v1189_v38 = vmul.f32 %v2001_v30, %v2006_v32 }
  0x86   : > { %v2063_v16 = vsel %vm405_vm1, %v989_v60, %v993_v11  ;;  %v722_v21 = vsel %vm405_vm1, %v720_v6, %v721_v9  ;;  %v2145_v11 = vld [vmem:[%s1821_s1 + $0x58] sm:$0x1] }
  0x87   : > { %v1201_v44 = vrot.slane %v1187_v37, 2  ;;  %v1202_v45 = vrot.slane %v1189_v38, 2 }
  0x89   : > { %540 = vrot.lane.b32.xlu1 %v531_v41, %s1673_s9  ;;  %538 = vrot.lane.b32.xlu0 %v530_v42, %s1673_s9  ;;  %v673_v41 = vmul.f32 %v668_v8, %v1904_v58  ;;  %v1191_v42 = vmul.f32 %v2014_v36, %v2006_v32  ;;  %v2034_v53 = vsel %vm405_vm1, %v1201_v44, %v1202_v45  ;;  %v2054_v8 = vstv %s2020_s6  ;;  %s1044_s6 = sadd.s32 2, %s1970_s21 }
  0x8a   : > { %v1228_v14 = vmul.f32 %v2001_v30, %v2054_v8  ;;  %v1230_v18 = vmul.f32 %v2014_v36, %v2054_v8  ;;  %v837_v44 = vstv %s836_s24  ;;  %s1045_s2 = sld [smem:[#allocation2 + %s1044_s6]]  ;;  %s874_s24 = sadd.s32 5, %s1968_s29 }
  0x8b   : > { %v1206_v51 = vrot.slane %v1191_v42, 2  ;;  %v794_v42 = vstv %s793_s20  ;;  %v2113_v50 = vmul.f32 %v2001_v30, %v837_v44  ;;  %v2117_v52 = vmul.f32 %v2094_v39, %v837_v44  ;;  %s300_s20 = sld [smem:[#allocation2 + %s299_s10]]  ;;  %s396_s6 = sadd.s32 6, %s1812_s30 }
  0x8c   : > { %v1241_v15 = vrot.slane %v1228_v14, 2  ;;  %v1245_v25 = vrot.slane %v1230_v18, 2  ;;  %v798_v54 = vmul.f32 %v2001_v30, %v794_v42  ;;  %v797_v55 = vmul.f32 %v2094_v39, %v794_v42  ;;  %v2148_v14 = vld [vmem:[%s1821_s1 + $0x50] sm:$0x1]  ;;  %s875_s28 = sld [smem:[#allocation2 + %s874_s24]]  ;;  %s931_s10 = sadd.s32 7, %s1968_s29 }
  0x8d   : > { %544 = vrot.lane.b32.xlu1 %v533_v4, %s1673_s9  ;;  %542 = vrot.lane.b32.xlu0 %v532_v49, %s1673_s9  ;;  %v689_v4 = vrot.slane %v674_v29, 2  ;;  %v709_v49 = vmul.f32 %v707_v35, %v1886_v46  ;;  %v687_v46 = vrot.slane %v673_v41, 2  ;;  %v2084_v29 = vld [vmem:[%s1821_s1 + $0x38] sm:$0xff]  ;;  %v851_v60 = vrot.slane %v2117_v52, 1 }
  0x8e   : > { %v2079_v26 = vsel %vm405_vm1, %v1241_v15, %v1245_v25  ;;  %v796_v47 = vmul.f32 %v2084_v29, %v794_v42  ;;  %v843_v18 = vmul.f32 %v2145_v11, %v837_v44 }
  0x8f   : > { %v690_v61 = vsel %vm405_vm1, %v685_v27, %v689_v4  ;;  %v723_v62 = vrot.slane %v709_v49, 2 }
  0x91   : > { %597 = vrot.lane.b32.xlu1 %v590_v59, %s1672_s4  ;;  %595 = vrot.lane.b32.xlu0 %v587_v63, %s1672_s4  ;;  %v2041_v59 = vsel %vm405_vm1, %v1202_v45, %v1206_v51  ;;  %v713_v63 = vmul.f32 %v707_v35, %v1901_v57  ;;  %v712_v57 = vmul.f32 %v707_v35, %v1904_v58  ;;  %v2087_v35 = vld [vmem:[%s1821_s1 + $0x30] sm:$0xff] }
  0x92   : > { %v725_v19 = vsel %vm405_vm1, %v723_v62, %v724_v5  ;;  %v2104_v45 = vld [vmem:[%s1821_s1 + $0x30] sm:$0xfe]  ;;  %v795_v4 = vmul.f32 %v2087_v35, %v794_v42 }
  0x93   : > { %v838_v51 = vmul.f32 %v2104_v45, %v837_v44 }
  0x95   : > { %601 = vrot.lane.b32.xlu1 %v594_v10, %s1672_s4  ;;  %599 = vrot.lane.b32.xlu0 %v592_v13, %s1672_s4  ;;  %v688_v10 = vsel %vm405_vm1, %v682_v40, %v687_v46  ;;  %v1226_v13 = vmul.f32 %v2004_v31, %v2054_v8  ;;  %v854_v46 = vrot.slane %v2113_v50, 1  ;;  %v850_v3 = vrot.slane %v838_v51, 1 }
  0x97   : > { %v1240_v17 = vrot.slane %v1226_v13, 2  ;;  %v852_v62 = vsel %vm308_vm0, %v850_v3, %v851_v60  ;;  %v1046_v13 = vstv %s1045_s2  ;;  %s1126_s2 = sadd.s32 5, %s1970_s21 }
  0x99   : > { %636 = vrot.lane.b32.xlu1 %v629_v22, %s1673_s9  ;;  %634 = vrot.lane.b32.xlu0 %v626_v23, %s1673_s9  ;;  %v728_v22 = vrot.slane %v713_v63, 2  ;;  %v726_v23 = vrot.slane %v712_v57, 2  ;;  %v2073_v24 = vsel %vm405_vm1, %v1240_v17, %v1241_v15  ;;  %v1021_v63 = vstv %s1020_s5  ;;  %s2162_s5 = sld [smem:[#allocation2 + %s1812_s30]] }
  0x9a   : > { %v1023_v2 = vmul.f32 %v2084_v29, %v1021_v63  ;;  %v1024_v57 = vmul.f32 %v2094_v39, %v1021_v63  ;;  %s2184_s30 = sld [smem:[#allocation2 + %s396_s6]] }
  0x9b   : > { %v729_v27 = vsel %vm405_vm1, %v724_v5, %v728_v22  ;;  %v1022_v5 = vmul.f32 %v2087_v35, %v1021_v63  ;;  %v842_v22 = vmul.f32 %v2148_v14, %v837_v44 }
  0x9d   : > { %640 = vrot.lane.b32.xlu1 %v633_v28, %s1673_s9  ;;  %638 = vrot.lane.b32.xlu0 %v631_v34, %s1673_s9  ;;  %v727_v28 = vsel %vm405_vm1, %v721_v9, %v726_v23  ;;  %v769_v34 = vstv %s768_s7  ;;  %s1087_s7 = sadd.s32 4, %s1970_s21  ;;  %v1025_v9 = vmul.f32 %v2001_v30, %v1021_v63 }
  0x9e   : > { %v771_v37 = vmul.f32 %v2084_v29, %v769_v34  ;;  %v770_v38 = vmul.f32 %v2087_v35, %v769_v34  ;;  %v773_v40 = vmul.f32 %v2001_v30, %v769_v34  ;;  %v772_v41 = vmul.f32 %v2094_v39, %v769_v34  ;;  %s1088_s11 = sld [smem:[#allocation2 + %s1087_s7]] }
  0x9f   : > { %v858_v34 = vrot.slane %v843_v18, 1  ;;  %s2187_s7 = sld [smem:[#allocation2 + %s1126_s2]]  ;;  %v244_v63 = vstv %s2162_s5  ;;  %s552_s5 = sadd.s32 3, %s1914_s25 }
  0xa0   : > { %s553_s6 = sld [smem:[#allocation2 + %s552_s5]] }
  0xa1   : > { %693 = vrot.lane.b32.xlu1 %v686_v43, %s1672_s4  ;;  %691 = vrot.lane.b32.xlu0 %v683_v56, %s1672_s4  ;;  %v2101_v43 = vld [vmem:[%s1821_s1 + $0x38] sm:$0xfe]  ;;  %v859_v51 = vsel %vm308_vm0, %v854_v46, %v858_v34  ;;  %v245_v34 = vmul.f32 %v244_v63, %v1828_v1  ;;  %s2342_s2 = sld [smem:[#allocation2 + %s1914_s25]] }
  0xa2   : > { %v839_v49 = vmul.f32 %v2101_v43, %v837_v44  ;;  %s2438_s5 = sld [smem:[#allocation2 + %s1970_s21]] }
  0xa4   : > { %v853_v56 = vrot.slane %v839_v49, 1 }
  0xa5   : > { %697 = vrot.lane.b32.xlu1 %v690_v61, %s1672_s4  ;;  %695 = vrot.lane.b32.xlu0 %v688_v10, %s1672_s4 }
  0xa6   : > { %v855_v61 = vsel %vm308_vm0, %v853_v56, %v854_v46  ;;  %v876_v56 = vstv %s875_s28 }
  0xa9   : > { %732 = vrot.lane.b32.xlu1 %v725_v19, %s1673_s9  ;;  %730 = vrot.lane.b32.xlu0 %v722_v21, %s1673_s9  ;;  %v1048_v19 = vmul.f32 %v2084_v29, %v1046_v13  ;;  %v1047_v21 = vmul.f32 %v2087_v35, %v1046_v13  ;;  %v1050_v29 = vmul.f32 %v2001_v30, %v1046_v13 }
  0xad   : > { %736 = vrot.lane.b32.xlu1 %v729_v27, %s1673_s9  ;;  %734 = vrot.lane.b32.xlu0 %v727_v28, %s1673_s9  ;;  %v1089_v27 = vstv %s1088_s11  ;;  %v301_v28 = vstv %s300_s20  ;;  %s2231_s11 = sld [smem:[#allocation2 + %s931_s10]]  ;;  %s215_s20 = sand.u32 1, %s1644_s13  }
  0xae   : > { %v1090_v42 = vmul.f32 %v2104_v45, %v1089_v27  ;;  %v1092_v44 = vmul.f32 %v2094_v39, %v1089_v27  ;;  %v302_v49 = vmul.f32 %v301_v28, %v1847_v12  ;;  %v303_v50 = vmul.f32 %v301_v28, %v1825_v0  ;;  %s1397_s24 = sshll.u32 %s215_s20, 6  ;;  %s913_s10 = sadd.s32 6, %s1968_s29 }
  0xaf   : > { %s2316_s28 = scalar_lea.vmem [#allocation7], %s1397_s24  ;;  %s914_s24 = sld [smem:[#allocation2 + %s913_s10]] }
  0xb0   : > { %v309_v46 = vrot.slane %v302_v49, 1  ;;  %s1674_s10 = smov [#allocation7]  }
  0xb1   : > { %780 = vrot.lane.b32.xlu1 %v771_v37, %s1672_s4  ;;  %778 = vrot.lane.b32.xlu0 %v770_v38, %s1672_s4  ;;  %v1049_v37 = vmul.f32 %v2094_v39, %v1046_v13  ;;  %v856_v38 = vrot.slane %v842_v22, 1  ;;  %v2202_v13 = vmul.f32 %v2001_v30, %v876_v56  ;;  %v2208_v22 = vmul.f32 %v2094_v39, %v876_v56 }
  0xb3   : > { %v857_v52 = vsel %vm308_vm0, %v851_v60, %v856_v38  ;;  %v878_v60 = vmul.f32 %v2101_v43, %v876_v56  ;;  %v893_v49 = vrot.slane %v2202_v13, 1 }
  0xb5   : > { %784 = vrot.lane.b32.xlu1 %v773_v40, %s1672_s4  ;;  %782 = vrot.lane.b32.xlu0 %v772_v41, %s1672_s4  ;;  %v1091_v40 = vmul.f32 %v2101_v43, %v1089_v27  ;;  %v1093_v41 = vmul.f32 %v2001_v30, %v1089_v27 }
  0xb7   : > { %v1105_v12 = vrot.slane %v1091_v40, 1  ;;  %v1106_v3 = vrot.slane %v1093_v41, 1  ;;  %v398_v41 = vstv %s2184_s30  ;;  %s648_s30 = sadd.s32 6, %s1914_s25 }
  0xb9   : > { %805 = vrot.lane.b32.xlu1 %v796_v47, %s1673_s9  ;;  %803 = vrot.lane.b32.xlu0 %v795_v4, %s1673_s9 }
  0xbd   : > { %809 = vrot.lane.b32.xlu1 %v798_v54, %s1673_s9  ;;  %807 = vrot.lane.b32.xlu0 %v797_v55, %s1673_s9  ;;  %v1095_v54 = vmul.f32 %v2145_v11, %v1089_v27  ;;  %v1094_v55 = vmul.f32 %v2148_v14, %v1089_v27  ;;  %v1107_v27 = vsel %vm308_vm0, %v1105_v12, %v1106_v3 }
  0xbe   : > { %v881_v12 = vmul.f32 %v2148_v14, %v876_v56 }
  0xbf   : > { %v1110_v18 = vrot.slane %v1095_v54, 1  ;;  %v890_v54 = vrot.slane %v2208_v22, 1 }
  0xc0   : > { %v895_v13 = vrot.slane %v881_v12, 1 }
  0xc1   : > { %862 = vrot.lane.b32.xlu1 %v855_v61, %s1672_s4  ;;  %860 = vrot.lane.b32.xlu0 %v852_v62, %s1672_s4  ;;  %v1102_v61 = vrot.slane %v1090_v42, 1  ;;  %v1103_v62 = vrot.slane %v1092_v44, 1  ;;  %v892_v44 = vrot.slane %v878_v60, 1  ;;  %v1111_v1 = vsel %vm308_vm0, %v1106_v3, %v1110_v18 }
  0xc3   : > { %v2136_v6 = vpop.permute.xlu1 %262  ;;  %v2138_v10 = vpop.permute.xlu0 %258 }
  0xc5   : > { %1032 = vrot.lane.b32.xlu1 %v1023_v2, %s1672_s4  ;;  %1030 = vrot.lane.b32.xlu0 %v1022_v5, %s1672_s4  ;;  %v310_v5 = vrot.slane %v303_v50, 1  ;;  %v1128_v50 = vstv %s2187_s7  ;;  %s1069_s7 = sadd.s32 3, %s1970_s21 }
  0xc7   : > { %v2151_v17 = vpop.permute.xlu1 %264  ;;  %v2153_v15 = vpop.permute.xlu0 %260 }
  0xc8   : > { %v267_v42 = vsel %vm266_vm2, %v2138_v10, %v2153_v15  ;;  %v399_v15 = vmul.f32 %v398_v41, %v1889_v48  ;;  %v2248_v48 = vmul.f32 %v2001_v30, %v1128_v50 }
  0xc9   : > { %1036 = vrot.lane.b32.xlu1 %v1025_v9, %s1672_s4  ;;  %1034 = vrot.lane.b32.xlu0 %v1024_v57, %s1672_s4  ;;  %v304_v57 = vmul.f32 %v301_v28, %v1861_v20  ;;  %v246_v20 = vmul.f32 %v244_v63, %v1825_v0  ;;  %v1104_v28 = vsel %vm308_vm0, %v1102_v61, %v1103_v62 }
  0xca   : > { %v271_v61 = vadd.f32 %v267_v42, %v245_v34 }
  0xcb   : > { %v2164_v23 = vpop.permute.xlu1 %286  ;;  %v2166_v25 = vpop.permute.xlu0 %284  ;;  %v312_v38 = vrot.slane %v304_v57, 1  ;;  %v1130_v57 = vmul.f32 %v2101_v43, %v1128_v50 }
  0xcc   : > { %v293_v10 = vsel %vm292_vm3, %v2166_v25, %v2164_v23  ;;  %v268_v23 = vsel %vm266_vm2, %v2136_v6, %v2151_v17  ;;  %v1129_v25 = vmul.f32 %v2104_v45, %v1128_v50  ;;  %v406_v17 = vrot.slane %v399_v15, 2 }
  0xcd   : > { %1057 = vrot.lane.b32.xlu1 %v1048_v19, %s1673_s9  ;;  %1055 = vrot.lane.b32.xlu0 %v1047_v21, %s1673_s9  ;;  %v1108_v19 = vrot.slane %v1094_v55, 1  ;;  %v877_v21 = vmul.f32 %v2104_v45, %v876_v56  ;;  %v882_v55 = vmul.f32 %v2145_v11, %v876_v56  ;;  %v313_v3 = vsel %vm308_vm0, %v310_v5, %v312_v38 }
  0xce   : > { %v2252_v56 = vmul.f32 %v2094_v39, %v1128_v50  ;;  %v272_v18 = vadd.f32 %v268_v23, %v246_v20  ;;  %v1145_v38 = vrot.slane %v2248_v48, 1  ;;  %v1141_v42 = vrot.slane %v1129_v25, 1  ;;  %v2294_v48 = vld [vmem:[%s1821_s1 + $0x50] sm:$0x3] }
  0xcf   : > { %v2178_v47 = vpop.permute.xlu1 %290  ;;  %v2180_v4 = vpop.permute.xlu0 %288  ;;  %v897_v60 = vrot.slane %v882_v55, 1  ;;  %v1134_v20 = vmul.f32 %v2145_v11, %v1128_v50  ;;  %v2278_v55 = vld [vmem:[%s1821_s1 + $0x30] sm:$0xfc] }
  0xd0   : > { %v294_v6 = vsel %vm292_vm3, %v2180_v4, %v2178_v47  ;;  %v1142_v47 = vrot.slane %v2252_v56, 1 }
  0xd1   : > { %1061 = vrot.lane.b32.xlu1 %v1050_v29, %s1673_s9  ;;  %1059 = vrot.lane.b32.xlu0 %v1049_v37, %s1673_s9  ;;  %v311_v29 = vsel %vm308_vm0, %v309_v46, %v310_v5  ;;  %v2241_v46 = vmul.f32 %v398_v41, %v1825_v0  ;;  %v297_v5 = vadd.f32 %v293_v10, %v271_v61 }
  0xd2   : > { %v894_v0 = vsel %vm308_vm0, %v892_v44, %v893_v49  ;;  %v298_v4 = vadd.f32 %v294_v6, %v272_v18 }
  0xd3   : > { %v2195_v2 = vpop.permute.xlu1 %345  ;;  %v2197_v9 = vpop.permute.xlu0 %343  ;;  %v407_v22 = vrot.slane %v2241_v46, 2  ;;  %v316_v44 = vadd.f32 %v311_v29, %v297_v5 }
  0xd4   : > { %v351_v34 = vsel %vm266_vm2, %v2197_v9, %v2195_v2  ;;  %v896_v2 = vsel %vm308_vm0, %v890_v54, %v895_v13  ;;  %v1133_v9 = vmul.f32 %v2148_v14, %v1128_v50 }
  0xd5   : > { %866 = vrot.lane.b32.xlu1 %v859_v51, %s1672_s4  ;;  %864 = vrot.lane.b32.xlu0 %v857_v52, %s1672_s4  ;;  %v1109_v51 = vsel %vm308_vm0, %v1103_v62, %v1108_v19  ;;  %v889_v52 = vrot.slane %v877_v21, 1  ;;  %v408_v29 = vsel %vm405_vm1, %v406_v17, %v407_v22 }
  0xd7   : > { %v2216_v37 = vpop.permute.xlu1 %349  ;;  %v2218_v40 = vpop.permute.xlu0 %347  ;;  %v891_v43 = vsel %vm308_vm0, %v889_v52, %v890_v54  ;;  %v317_v54 = vadd.f32 %v313_v3, %v298_v4 }
  0xd8   : > { %v352_v11 = vsel %vm266_vm2, %v2218_v40, %v2216_v37  ;;  %v1147_v37 = vrot.slane %v1133_v9, 1 }
  0xd9   : > { %1114 = vrot.lane.b32.xlu1 %v1107_v27, %s1672_s4  ;;  %1112 = vrot.lane.b32.xlu0 %v1104_v28, %s1672_s4  ;;  %v401_v27 = vmul.f32 %v398_v41, %v1904_v58  ;;  %v1144_v28 = vrot.slane %v1130_v57, 1  ;;  %v933_v58 = vstv %s2231_s11  ;;  %v356_v23 = vadd.f32 %v352_v11, %v317_v54  ;;  %s1070_s11 = sld [smem:[#allocation2 + %s1069_s7]] }
  0xda   : > { %v935_v50 = vmul.f32 %v2004_v31, %v933_v58  ;;  %v934_v40 = vmul.f32 %v2278_v55, %v933_v58  ;;  %v936_v57 = vmul.f32 %v2094_v39, %v933_v58  ;;  %v1190_v11 = vmul.f32 %v2294_v48, %v2006_v32 }
  0xdb   : > { %v385_v63 = vpop.permute.xlu1 %384  ;;  %v383_v62 = vpop.permute.xlu0 %382  ;;  %v409_v15 = vrot.slane %v401_v27, 2  ;;  %v1146_v12 = vsel %vm308_vm0, %v1144_v28, %v1145_v38 }
  0xdc   : > { %v390_v41 = vsel %vm292_vm3, %v383_v62, %v385_v63  ;;  %v1149_v63 = vrot.slane %v1134_v20, 1  ;;  %v937_v62 = vmul.f32 %v2001_v30, %v933_v58  ;;  %v949_v5 = vrot.slane %v935_v50, 2 }
  0xdd   : > { %1118 = vrot.lane.b32.xlu1 %v1111_v1, %s1672_s4  ;;  %1116 = vrot.lane.b32.xlu0 %v1109_v51, %s1672_s4  ;;  %v898_v1 = vsel %vm308_vm0, %v893_v49, %v897_v60  ;;  %v355_v51 = vadd.f32 %v351_v34, %v316_v44  ;;  %v1143_v49 = vsel %vm308_vm0, %v1141_v42, %v1142_v47  ;;  %v946_v13 = vrot.slane %v934_v40, 2 }
  0xde   : > { %v410_v56 = vsel %vm405_vm1, %v407_v22, %v409_v15  ;;  %v939_v30 = vmul.f32 %v2014_v36, %v933_v58  ;;  %v1150_v6 = vsel %vm308_vm0, %v1145_v38, %v1149_v63  ;;  %v950_v17 = vrot.slane %v937_v62, 2 }
  0xdf   : > { %v389_v19 = vpop.permute.xlu1 %388  ;;  %v387_v21 = vpop.permute.xlu0 %386  ;;  %v394_v61 = vadd.f32 %v390_v41, %v355_v51  ;;  %v1148_v60 = vsel %vm308_vm0, %v1142_v47, %v1147_v37  ;;  %v947_v18 = vrot.slane %v936_v57, 2  ;;  %v1186_v20 = vmul.f32 %v2278_v55, %v2006_v32 }
  0xe0   : > { %v391_v46 = vsel %vm292_vm3, %v387_v21, %v389_v19  ;;  %v938_v19 = vmul.f32 %v2294_v48, %v933_v58  ;;  %v951_v38 = vsel %vm405_vm1, %v949_v5, %v950_v17  ;;  %v954_v47 = vrot.slane %v939_v30, 2 }
  0xe1   : > { %901 = vrot.lane.b32.xlu1 %v894_v0, %s1673_s9  ;;  %899 = vrot.lane.b32.xlu0 %v891_v43, %s1673_s9  ;;  %v395_v0 = vadd.f32 %v391_v46, %v356_v23  ;;  %v413_v43 = vadd.f32 %v408_v29, %v394_v61  ;;  %v948_v4 = vsel %vm405_vm1, %v946_v13, %v947_v18  ;;  %v1204_v54 = vrot.slane %v1190_v11, 2 }
  0xe2   : > { %v952_v44 = vrot.slane %v938_v19, 2  ;;  %v1188_v58 = vmul.f32 %v2094_v39, %v2006_v32  ;;  %v973_v61 = vmul.f32 %v2278_v55, %v2008_v33  ;;  %v975_v63 = vmul.f32 %v2094_v39, %v2008_v33  ;;  %v1531_v19 = vld [vmem:[%s1821_s1 + $0x10] sm:$0xff] }
  0xe3   : > { %v443_v52 = vpop.permute.xlu1 %442  ;;  %v441_v10 = vpop.permute.xlu0 %440  ;;  %v414_v34 = vadd.f32 %v410_v56, %v395_v0  ;;  %v977_v57 = vmul.f32 %v2294_v48, %v2008_v33  ;;  %v1227_v33 = vmul.f32 %v2094_v39, %v2054_v8  ;;  %v499_v13 = vstv %s2342_s2  ;;  %s1424_s2 = sshll.u32 %s1656_s16, 4  ;;  %s1281_s16 = sshll.u32 %s2316_s28, 4  ;;  %s2520_s16 = int_to_ptr.vmem [resolvable:$true] %s1281_s16 }
  0xe4   : > { %v448_v25 = vsel %vm266_vm2, %v441_v10, %v443_v52  ;;  %v955_v52 = vsel %vm405_vm1, %v950_v17, %v954_v47  ;;  %v953_v29 = vsel %vm405_vm1, %v947_v18, %v952_v44  ;;  %v1198_v10 = vrot.slane %v1186_v20, 2  ;;  %s1566_s7 = scalar_lea.vmem %s2520_s16, 1024 }
  0xe5   : > { %905 = vrot.lane.b32.xlu1 %v898_v1, %s1673_s9  ;;  %903 = vrot.lane.b32.xlu0 %v896_v2, %s1673_s9  ;;  %v452_v21 = vadd.f32 %v448_v25, %v413_v43  ;;  %v1199_v15 = vrot.slane %v1188_v58, 2  ;;  %v985_v37 = vrot.slane %v973_v61, 2  ;;  %v986_v40 = vrot.slane %v975_v63, 2  ;;  %p1567_p10 = scmp.ne.s32.totalorder %s2520_s16, %s1566_s7 }
  0xe6   : > { %v1225_v25 = vmul.f32 %v2278_v55, %v2054_v8  ;;  %v1238_v0 = vrot.slane %v1227_v33, 2  ;;  %v1229_v43 = vmul.f32 %v2294_v48, %v2054_v8  ;;  %v554_v17 = vstv %s553_s6 }
  0xe7   : > { %v447_v31 = vpop.permute.xlu1 %446  ;;  %v445_v3 = vpop.permute.xlu0 %444  ;;  %v1200_v50 = vsel %vm405_vm1, %v1198_v10, %v1199_v15  ;;  %v1205_v32 = vsel %vm405_vm1, %v1199_v15, %v1204_v54  ;;  %v1534_v15 = vld [vmem:[%s1821_s1] sm:$0xfc]  ;;  %p1568_p0 = pnand %p1567_p10, %p2596_p12 }
  0xe8   : > { %v449_v27 = vsel %vm266_vm2, %v445_v3, %v447_v31  ;;  %v991_v3 = vrot.slane %v977_v57, 2  ;;  %v1237_v30 = vrot.slane %v1225_v25, 2 }
  0xe9   : > { %1153 = vrot.lane.b32.xlu1 %v1146_v12, %s1673_s9  ;;  %1151 = vrot.lane.b32.xlu0 %v1143_v49, %s1673_s9  ;;  %v453_v41 = vadd.f32 %v449_v27, %v414_v34  ;;  %v1532_v27 = vld [vmem:[%s1821_s1] sm:$0xff]  ;;  %p1569_p2 = pneg %p1568_p0 }
  0xea   : > { %v500_v8 = vmul.f32 %v1532_v27, %v499_v13 }
  0xeb   : > { %v482_v22 = vpop.permute.xlu1 %481  ;;  %v480_v36 = vpop.permute.xlu0 %479 }
  0xec   : > { %v487_v28 = vsel %vm292_vm3, %v480_v36, %v482_v22  ;;  %v1239_v22 = vsel %vm405_vm1, %v1237_v30, %v1238_v0  ;;  %v1243_v36 = vrot.slane %v1229_v43, 2 }
  0xed   : > { %v491_v42 = vadd.f32 %v487_v28, %v452_v21  ;;  %1157 = vrot.lane.b32.xlu1 %v1150_v6, %s1673_s9  ;;  %1155 = vrot.lane.b32.xlu0 %v1148_v60, %s1673_s9  ;;  %v556_v21 = vmul.f32 %v1531_v19, %v554_v17 }
  0xee   : > { %v1244_v20 = vsel %vm405_vm1, %v1238_v0, %v1243_v36 }
  0xef   : > { %493 = vst [vmem:[%s2316_s28] sm:$0xff] %v491_v42  ;;  %v486_v1 = vpop.permute.xlu1 %485  ;;  %v484_v2 = vpop.permute.xlu0 %483  ;;  %v562_v44 = vrot.slane %v556_v21, 1 }
  0xf0   : > { %v488_v9 = vsel %vm292_vm3, %v484_v2, %v486_v1 }
  0xf1   : > { %v492_v51 = vadd.f32 %v488_v9, %v453_v41  ;;  %958 = vrot.lane.b32.xlu1 %v951_v38, %s1672_s4  ;;  %956 = vrot.lane.b32.xlu0 %v948_v4, %s1672_s4  ;;  %v1533_v38 = vld [vmem:[%s1821_s1 + $0x20] sm:$0x1]  ;;  %v501_v41 = vmul.f32 %v1531_v19, %v499_v13 }
  0xf2   : > { %v557_v47 = vmul.f32 %v1533_v38, %v554_v17 }
  0xf3   : > { %494 = vst [vmem:[%s2316_s28 + $0x8] sm:$0xff] %v492_v51  ;;  %v516_v12 = vpop.permute.xlu1 %515  ;;  %v514_v49 = vpop.permute.xlu0 %513 }
  0xf4   : > { %v521_v42 = vsel %vm266_vm2, %v514_v49, %v516_v12 }
  0xf5   : > { %962 = vrot.lane.b32.xlu1 %v955_v52, %s1672_s4  ;;  %960 = vrot.lane.b32.xlu0 %v953_v29, %s1672_s4  ;;  %v525_v58 = vadd.f32 %v521_v42, %v500_v8  ;;  %v564_v29 = vrot.slane %v557_v47, 1 }
  0xf7   : > { %v520_v62 = vpop.permute.xlu1 %519  ;;  %v518_v46 = vpop.permute.xlu0 %517 }
  0xf8   : > { %v522_v51 = vsel %vm266_vm2, %v518_v46, %v520_v62 }
  0xf9   : > { %1210 = vrot.lane.b32.xlu1 %v2034_v53, %s1672_s4  ;;  %1208 = vrot.lane.b32.xlu0 %v1200_v50, %s1672_s4  ;;  %v987_v53 = vsel %vm405_vm1, %v985_v37, %v986_v40  ;;  %v526_v49 = vadd.f32 %v522_v51, %v501_v41 }
  0xfb   : > { %v541_v23 = vpop.permute.xlu1 %540  ;;  %v539_v31 = vpop.permute.xlu0 %538 }
  0xfd   : > { %1214 = vrot.lane.b32.xlu1 %v2041_v59, %s1672_s4  ;;  %1212 = vrot.lane.b32.xlu0 %v1205_v32, %s1672_s4  ;;  %v992_v59 = vsel %vm405_vm1, %v986_v40, %v991_v3  ;;  %s649_s4 = sld [smem:[#allocation2 + %s648_s30]]  ;;  %v1535_v40 = vld [vmem:[%s1821_s1 + $0x20] sm:$0x3] }
  0xff   : > { %v545_v56 = vpop.permute.xlu1 %544  ;;  %v543_v5 = vpop.permute.xlu0 %542 }
 0x101   : > { %997 = vrot.lane.b32.xlu1 %v2051_v7, %s1673_s9  ;;  %995 = vrot.lane.b32.xlu0 %v987_v53, %s1673_s9  ;;  %v1530_v7 = vld [vmem:[%s1821_s1] sm:$0xfe]  ;;  %s817_s1 = sadd.s32 3, %s1968_s29 }
 0x102   : > { %v555_v18 = vmul.f32 %v1530_v7, %v554_v17  ;;  %s818_s25 = sld [smem:[#allocation2 + %s817_s1]] }
 0x103   : > { %v598_v6 = vpop.permute.xlu1 %597  ;;  %v596_v60 = vpop.permute.xlu0 %595  ;;  %v650_v9 = vstv %s649_s4 }
 0x104   : > { %v561_v4 = vrot.slane %v555_v18, 1  ;;  %v651_v11 = vmul.f32 %v1534_v15, %v650_v9  ;;  %v652_v12 = vmul.f32 %v1531_v19, %v650_v9  ;;  %v603_v61 = vsel %vm266_vm2, %v596_v60, %v598_v6 }
 0x105   : > { %1001 = vrot.lane.b32.xlu1 %v2063_v16, %s1673_s9  ;;  %999 = vrot.lane.b32.xlu0 %v992_v59, %s1673_s9  ;;  %v546_v16 = vsel %vm292_vm3, %v539_v31, %v541_v23  ;;  %v653_v57 = vmul.f32 %v1535_v40, %v650_v9 }
 0x106   : > { %v550_v52 = vadd.f32 %v546_v16, %v525_v58  ;;  %v563_v10 = vsel %vm308_vm0, %v561_v4, %v562_v44  ;;  %v657_v32 = vrot.slane %v651_v11, 2  ;;  %v658_v37 = vrot.slane %v652_v12, 2 }
 0x107   : > { %v602_v28 = vpop.permute.xlu1 %601  ;;  %v600_v34 = vpop.permute.xlu0 %599  ;;  %v660_v59 = vrot.slane %v653_v57, 2 }
 0x108   : > { %v568_v62 = vadd.f32 %v563_v10, %v550_v52  ;;  %v604_v3 = vsel %vm266_vm2, %v600_v34, %v602_v28 }
 0x109   : > { %1249 = vrot.lane.b32.xlu1 %v2073_v24, %s1673_s9  ;;  %1247 = vrot.lane.b32.xlu0 %v1239_v22, %s1673_s9  ;;  %v547_v24 = vsel %vm292_vm3, %v543_v5, %v545_v56  ;;  %v659_v5 = vsel %vm405_vm1, %v657_v32, %v658_v37  ;;  %v661_v13 = vsel %vm405_vm1, %v658_v37, %v660_v59 }
 0x10a   : > { %v551_v63 = vadd.f32 %v547_v24, %v526_v49  ;;  %v607_v23 = vadd.f32 %v603_v61, %v568_v62 }
 0x10b   : > { %v637_v1 = vpop.permute.xlu1 %636  ;;  %v635_v2 = vpop.permute.xlu0 %634 }
 0x10c   : > { %v642_v46 = vsel %vm292_vm3, %v635_v2, %v637_v1 }
 0x10d   : > { %1253 = vrot.lane.b32.xlu1 %v2079_v26, %s1673_s9  ;;  %1251 = vrot.lane.b32.xlu0 %v1244_v20, %s1673_s9  ;;  %v565_v26 = vsel %vm308_vm0, %v562_v44, %v564_v29  ;;  %v646_v33 = vadd.f32 %v642_v46, %v607_v23  ;;  %s2389_s9 = sld [smem:[#allocation2 + %s1968_s29]]  ;;  %s1165_s29 = sadd.s32 6, %s1970_s21 }
 0x10e   : > { %v569_v25 = vadd.f32 %v565_v26, %v551_v63  ;;  %s1166_s6 = sld [smem:[#allocation2 + %s1165_s29]]  ;;  %s1430_s21 = sshll.u32 %s1652_s15, 3 }
 0x10f   : > { %v641_v50 = vpop.permute.xlu1 %640  ;;  %v639_v54 = vpop.permute.xlu0 %638  ;;  %v664_v60 = vadd.f32 %v659_v5, %v646_v33  ;;  %s1278_s30 = sadd.s32 %s1430_s21, %s1424_s2 }
 0x110   : > { %v643_v56 = vsel %vm292_vm3, %v639_v54, %v641_v50  ;;  %v608_v30 = vadd.f32 %v604_v3, %v569_v25  ;;  %v819_v3 = vstv %s818_s25  ;;  %s1425_s15 = sshll.u32 %s1278_s30, 7  ;;  %s2525_s25 = scalar_lea.sflag [#allocation3], %s215_s20 }
 0x111   : > { %v821_v5 = vmul.f32 %v2094_v39, %v819_v3  ;;  %s2518_s1 = scalar_lea.hbm %s2580_s3, %s1425_s15 }
 0x112   : > { %v647_v17 = vadd.f32 %v643_v56, %v608_v30  ;;  %v820_v56 = vmul.f32 %v2104_v45, %v819_v3 }
 0x113   : > { %v694_v31 = vpop.permute.xlu1 %693  ;;  %v692_v53 = vpop.permute.xlu0 %691  ;;  %v764_v8 = vstv %s2389_s9 }
 0x114   : > { %v699_v6 = vsel %vm266_vm2, %v692_v53, %v694_v31  ;;  %v665_v36 = vadd.f32 %v661_v13, %v647_v17  ;;  %v765_v16 = vmul.f32 %v2087_v35, %v764_v8  ;;  %v827_v17 = vrot.slane %v821_v5, 1 }
 0x115   : > { %v703_v7 = vadd.f32 %v699_v6, %v664_v60  ;;  %v822_v60 = vmul.f32 %v2148_v14, %v819_v3  ;;  %v915_v13 = vstv %s914_s24  ;;  %v1167_v5 = vstv %s1166_s6 }
 0x117   : > { %v698_v0 = vpop.permute.xlu1 %697  ;;  %v696_v43 = vpop.permute.xlu0 %695 }
 0x118   : > { %v700_v21 = vsel %vm266_vm2, %v696_v43, %v698_v0  ;;  %v1071_v0 = vstv %s1070_s11  ;;  %v826_v43 = vrot.slane %v820_v56, 1  ;;  %s1570_s11 = sshll.u32 %s1674_s10, 4  ;;  %s1571_s11 = int_to_ptr.vmem [resolvable:$false] %s1570_s11 }
 0x119   : > { %v704_v28 = vadd.f32 %v700_v21, %v665_v36  ;;  %v1016_v36 = vstv %s2438_s5  ;;  %s1572_s24 = scalar_lea.vmem %s1571_s11, 2048  ;;  %p1573_p7 = scmp.lt.s32.totalorder %s2520_s16, %s1571_s11 }
 0x11a   : > { %p1574_p9 = scmp.lt.s32.totalorder %s1572_s24, %s1566_s7 }
 0x11b   : > { %v733_v18 = vpop.permute.xlu1 %732  ;;  %v731_v19 = vpop.permute.xlu0 %730 }
 0x11c   : > { %v738_v22 = vsel %vm292_vm3, %v731_v19, %v733_v18  ;;  %v1072_v18 = vmul.f32 %v2104_v45, %v1071_v0  ;;  %v1073_v19 = vmul.f32 %v2094_v39, %v1071_v0  ;;  %p1575_p11 = por %p1574_p9, %p1573_p7 }
 0x11d   : > { %v742_v27 = vadd.f32 %v738_v22, %v703_v7  ;;  %v766_v7 = vmul.f32 %v2094_v39, %v764_v8  ;;  %v1017_v8 = vmul.f32 %v2087_v35, %v1016_v36 }
 0x11e   : > { %v1078_v45 = vrot.slane %v1072_v18, 1  ;;  %p1576_p13 = pnand %p1575_p11, %p1569_p2 }
 0x11f   : > { %1401 = vst [vmem:[%s2316_s28 + $0x10] sm:$0xff] %v742_v27  ;;  %v737_v34 = vpop.permute.xlu1 %736  ;;  %v735_v42 = vpop.permute.xlu0 %734 }
 0x120   : > { %v739_v38 = vsel %vm292_vm3, %v735_v42, %v737_v34  ;;  %v917_v34 = vmul.f32 %v2094_v39, %v915_v13 }
 0x121   : > { %v743_v47 = vadd.f32 %v739_v38, %v704_v28  ;;  %v916_v28 = vmul.f32 %v2278_v55, %v915_v13  ;;  %v828_v38 = vsel %vm308_vm0, %v826_v43, %v827_v17 }
 0x122   : > { %v923_v3 = vrot.slane %v917_v34, 2 }
 0x123   : > { %1402 = vst [vmem:[%s2316_s28 + $0x18] sm:$0xff] %v743_v47  ;;  %v781_v4 = vpop.permute.xlu1 %780  ;;  %v779_v44 = vpop.permute.xlu0 %778  ;;  %v829_v47 = vrot.slane %v822_v60, 1 }
 0x124   : > { %v786_v20 = vsel %vm266_vm2, %v779_v44, %v781_v4  ;;  %v1079_v4 = vrot.slane %v1073_v19, 1 }
 0x125   : > { %v790_v58 = vadd.f32 %v786_v20, %v765_v16  ;;  %v830_v56 = vsel %vm308_vm0, %v827_v17, %v829_v47 }
 0x127   : > { %v785_v41 = vpop.permute.xlu1 %784  ;;  %v783_v1 = vpop.permute.xlu0 %782 }
 0x128   : > { %v787_v2 = vsel %vm266_vm2, %v783_v1, %v785_v41  ;;  %v1074_v1 = vmul.f32 %v2148_v14, %v1071_v0  ;;  %v1080_v14 = vsel %vm308_vm0, %v1078_v45, %v1079_v4 }
 0x129   : > { %v791_v16 = vadd.f32 %v787_v2, %v766_v7  ;;  %v1018_v2 = vmul.f32 %v2094_v39, %v1016_v36 }
 0x12b   : > { %v806_v9 = vpop.permute.xlu1 %805  ;;  %v804_v51 = vpop.permute.xlu0 %803 }
 0x12c   : > { %v811_v6 = vsel %vm292_vm3, %v804_v51, %v806_v9  ;;  %v918_v9 = vmul.f32 %v2294_v48, %v915_v13 }
 0x12d   : > { %v815_v27 = vadd.f32 %v811_v6, %v790_v58 }
 0x12f   : > { %v810_v52 = vpop.permute.xlu1 %809  ;;  %v808_v29 = vpop.permute.xlu0 %807 }
 0x130   : > { %v812_v42 = vsel %vm292_vm3, %v808_v29, %v810_v52  ;;  %v833_v52 = vadd.f32 %v828_v38, %v815_v27  ;;  %v922_v29 = vrot.slane %v916_v28, 2  ;;  %v1170_v38 = vmul.f32 %v2294_v48, %v1167_v5 }
 0x131   : > { %v816_v51 = vadd.f32 %v812_v42, %v791_v16 }
 0x133   : > { %v863_v24 = vpop.permute.xlu1 %862  ;;  %v861_v10 = vpop.permute.xlu0 %860  ;;  %v834_v60 = vadd.f32 %v830_v56, %v816_v51 }
 0x134   : > { %v868_v41 = vsel %vm266_vm2, %v861_v10, %v863_v24 }
 0x135   : > { %v872_v10 = vadd.f32 %v868_v41, %v833_v52 }
 0x137   : > { %v1033_v15 = vpop.permute.xlu1 %1032  ;;  %v1031_v11 = vpop.permute.xlu0 %1030 }
 0x138   : > { %v1038_v58 = vsel %vm266_vm2, %v1031_v11, %v1033_v15 }
 0x139   : > { %v1042_v15 = vadd.f32 %v1038_v58, %v1017_v8  ;;  %v1177_v58 = vrot.slane %v1170_v38, 2 }
 0x13b   : > { %v2402_v12 = vpop.permute.xlu1 %1036  ;;  %v2404_v49 = vpop.permute.xlu0 %1034 }
 0x13c   : > { %v1039_v43 = vsel %vm266_vm2, %v2404_v49, %v2402_v12  ;;  %v1168_v12 = vmul.f32 %v2278_v55, %v1167_v5  ;;  %v1169_v49 = vmul.f32 %v2094_v39, %v1167_v5 }
 0x13e   : > { %v1174_v34 = vrot.slane %v1168_v12, 2  ;;  %v1175_v42 = vrot.slane %v1169_v49, 2 }
 0x13f   : > { %v2406_v50 = vpop.permute.xlu1 %1057  ;;  %v2408_v54 = vpop.permute.xlu0 %1055 }
 0x140   : > { %v1063_v35 = vsel %vm292_vm3, %v2408_v54, %v2406_v50  ;;  %v1081_v50 = vrot.slane %v1074_v1, 1  ;;  %v925_v54 = vrot.slane %v918_v9, 2  ;;  %v1176_v41 = vsel %vm405_vm1, %v1174_v34, %v1175_v42 }
 0x141   : > { %v1067_v17 = vadd.f32 %v1063_v35, %v1042_v15 }
 0x142   : > { %v1082_v27 = vsel %vm308_vm0, %v1079_v4, %v1081_v50 }
 0x143   : > { %v2410_v61 = vpop.permute.xlu1 %1061  ;;  %v2412_v63 = vpop.permute.xlu0 %1059 }
 0x144   : > { %v1064_v13 = vsel %vm292_vm3, %v2412_v63, %v2410_v61  ;;  %v926_v63 = vsel %vm405_vm1, %v923_v3, %v925_v54 }
 0x147   : > { %v2414_v62 = vpop.permute.xlu1 %866  ;;  %v2416_v26 = vpop.permute.xlu0 %864 }
 0x148   : > { %v869_v6 = vsel %vm266_vm2, %v2416_v26, %v2414_v62  ;;  %v1043_v62 = vadd.f32 %v1039_v43, %v1018_v2 }
 0x149   : > { %v873_v26 = vadd.f32 %v869_v6, %v834_v60 }
 0x14a   : > { %v1068_v28 = vadd.f32 %v1064_v13, %v1043_v62 }
 0x14b   : > { %v2418_v46 = vpop.permute.xlu1 %1114  ;;  %v2420_v32 = vpop.permute.xlu0 %1112 }
 0x14c   : > { %v1120_v36 = vsel %vm266_vm2, %v2420_v32, %v2418_v46 }
 0x14f   : > { %v2423_v37 = vpop.permute.xlu1 %1118  ;;  %v2425_v40 = vpop.permute.xlu0 %1116 }
 0x153   : > { %v902_v57 = vpop.permute.xlu1 %901  ;;  %v900_v23 = vpop.permute.xlu0 %899 }
 0x154   : > { %v907_v24 = vsel %vm292_vm3, %v900_v23, %v902_v57  ;;  %v924_v23 = vsel %vm405_vm1, %v922_v29, %v923_v3 }
 0x155   : > { %v911_v57 = vadd.f32 %v907_v24, %v872_v10 }
 0x157   : > { %v2428_v31 = vpop.permute.xlu1 %905  ;;  %v2430_v53 = vpop.permute.xlu0 %903  ;;  %v929_v55 = vadd.f32 %v924_v23, %v911_v57 }
 0x158   : > { %v908_v7 = vsel %vm292_vm3, %v2430_v53, %v2428_v31  ;;  %v1085_v31 = vadd.f32 %v1080_v14, %v1067_v17 }
 0x159   : > { %v912_v53 = vadd.f32 %v908_v7, %v873_v26 }
 0x15a   : > { %v1124_v47 = vadd.f32 %v1120_v36, %v1085_v31 }
 0x15b   : > { %v2433_v25 = vpop.permute.xlu1 %1153  ;;  %v2435_v33 = vpop.permute.xlu0 %1151  ;;  %v930_v45 = vadd.f32 %v926_v63, %v912_v53 }
 0x15c   : > { %v1159_v39 = vsel %vm292_vm3, %v2435_v33, %v2433_v25  ;;  %v1086_v25 = vadd.f32 %v1082_v27, %v1068_v28 }
 0x15d   : > { %v1163_v33 = vadd.f32 %v1159_v39, %v1124_v47 }
 0x15f   : > { %v2442_v59 = vpop.permute.xlu1 %1157  ;;  %v2444_v30 = vpop.permute.xlu0 %1155  ;;  %v1181_v52 = vadd.f32 %v1176_v41, %v1163_v33 }
 0x160   : > { %v1160_v48 = vsel %vm292_vm3, %v2444_v30, %v2442_v59  ;;  %v1178_v30 = vsel %vm405_vm1, %v1175_v42, %v1177_v58 }
 0x163   : > { %v959_v21 = vpop.permute.xlu1 %958  ;;  %v957_v22 = vpop.permute.xlu0 %956 }
 0x164   : > { %v964_v61 = vsel %vm266_vm2, %v957_v22, %v959_v21  ;;  %v1121_v21 = vsel %vm266_vm2, %v2425_v40, %v2423_v37 }
 0x165   : > { %v968_v46 = vadd.f32 %v964_v61, %v929_v55  ;;  %v1125_v1 = vadd.f32 %v1121_v21, %v1086_v25 }
 0x167   : > { %v963_v44 = vpop.permute.xlu1 %962  ;;  %v961_v20 = vpop.permute.xlu0 %960  ;;  %v1164_v51 = vadd.f32 %v1160_v48, %v1125_v1 }
 0x168   : > { %v965_v22 = vsel %vm266_vm2, %v961_v20, %v963_v44 }
 0x169   : > { %v969_v9 = vadd.f32 %v965_v22, %v930_v45  ;;  %v1182_v24 = vadd.f32 %v1178_v30, %v1164_v51 }
 0x16b   : > { %v1211_v11 = vpop.permute.xlu1 %1210  ;;  %v1209_v0 = vpop.permute.xlu0 %1208 }
 0x16c   : > { %v1216_v44 = vsel %vm266_vm2, %v1209_v0, %v1211_v11 }
 0x16d   : > { %v1220_v29 = vadd.f32 %v1216_v44, %v1181_v52 }
 0x16f   : > { %v1215_v18 = vpop.permute.xlu1 %1214  ;;  %v1213_v19 = vpop.permute.xlu0 %1212 }
 0x170   : > { %v1217_v35 = vsel %vm266_vm2, %v1213_v19, %v1215_v18 }
 0x171   : > { %v1221_v15 = vadd.f32 %v1217_v35, %v1182_v24 }
 0x173   : > { %v998_v32 = vpop.permute.xlu1 %997  ;;  %v996_v16 = vpop.permute.xlu0 %995 }
 0x174   : > { %v1003_v8 = vsel %vm292_vm3, %v996_v16, %v998_v32 }
 0x175   : > { %v1007_v4 = vadd.f32 %v1003_v8, %v968_v46 }
 0x177   : > { %1416 = vst [vmem:[%s2316_s28 + $0x20] sm:$0xff] %v1007_v4  ;;  %v1002_v37 = vpop.permute.xlu1 %1001  ;;  %v1000_v40 = vpop.permute.xlu0 %999 }
 0x178   : > { %v1004_v20 = vsel %vm292_vm3, %v1000_v40, %v1002_v37 }
 0x179   : > { %v1008_v59 = vadd.f32 %v1004_v20, %v969_v9 }
 0x17b   : > { %1417 = vst [vmem:[%s2316_s28 + $0x28] sm:$0xff] %v1008_v59  ;;  %v1250_v3 = vpop.permute.xlu1 %1249  ;;  %v1248_v2 = vpop.permute.xlu0 %1247 }
 0x17c   : > { %v1255_v56 = vsel %vm292_vm3, %v1248_v2, %v1250_v3 }
 0x17d   : > { %v1259_v10 = vadd.f32 %v1255_v56, %v1220_v29 }
 0x17f   : > { %1419 = vst [vmem:[%s2316_s28 + $0x30] sm:$0xff] %v1259_v10  ;;  %v1254_v14 = vpop.permute.xlu1 %1253  ;;  %v1252_v11 = vpop.permute.xlu0 %1251 }
 0x180   : > { %v1256_v5 = vsel %vm292_vm3, %v1252_v11, %v1254_v14 }
 0x181   : > { %v1260_v0 = vadd.f32 %v1256_v5, %v1221_v15 }
 0x183   : > { %1420 = vst [vmem:[%s2316_s28 + $0x38] sm:$0xff] %v1260_v0 }
 0x184   : > { %1579 = shalt.err (!%p1576_p13)
}
 0x185   : > { %s1580_s20 = scalar_lea.hbm %s2518_s1, 1024  ;;  %s1584_s29 = scalar_lea.hbm %s2580_s3, 4096 }
 0x186   : > { %p1581_p1 = scmp.ne.s32.totalorder %s2518_s1, %s1580_s20  ;;  %p1585_p6 = scmp.lt.u32.totalorder %s2518_s1, %s2580_s3 }
 0x187   : > { %p1586_p3 = scmp.lt.u32.totalorder %s1584_s29, %s1580_s20  ;;  %p1588_p10 = scmp.lt.u32.totalorder %s1580_s20, %s2518_s1 }
 0x188   : > { %p1582_p4 = pnand %p1581_p1, %p2596_p12 }
 0x189   : > { %p1587_p8 = por %p1586_p3, %p1585_p6 }
 0x18a   : > { %p1583_p5 = pneg %p1582_p4 }
 0x18b   : > { %p1589_p0 = por %p1588_p10, %p1587_p8 }
 0x18d   : > { %p1590_p2 = pnand %p1589_p0, %p1583_p5 }
 0x18f   : > { %1593 = shalt.err (!%p1590_p2)
}
 0x190   : > { %s1675_s2 = smov 128   ;;  %s1676_s30 = smov 8  }
 0x191   : > { %1442 = dma.vmem_to_hbm [thread:$0]  (%p2596_p12), %s2520_s16, 1024, %s2518_s1, %s2525_s25, %s1675_s2, %s1675_s2, %s1676_s30  }
 0x192 PF: > { %p1459_p7 = scmp.ge.s32.totalorder %s1668_s19, 2  ;;  %s1296_s15 = sand.u32 1, %s1640_s12  }
 0x193   : > { %p2597_p9 = scmp.ne.s32.totalorder %s2588_s27, 0  ;;  %s1297_s4 = scalar_lea.sflag [#allocation3], %s1296_s15 }
 0x195   : > { %p1452_p11 = pnand %p1459_p7, %p2597_p9 }
 0x197   : > { %1635 = dma.done.wait (!%p1452_p11), %s1297_s4, 1024  }
 0x198   : > { %1637 = vsyncadd (!%p1452_p11), %s1297_s4, 4294966272  ;;  %s18_s19 = sadd.s32 1, %s1668_s19   ;;  %s2598_s12 = smov %s1644_s13 }
 0x199   : > { %p15_p13 = scmp.ge.s32.totalorder %s18_s19, 6   ;;  %s2599_s13 = smov %s1648_s14 }
 0x19a   : > { %s2600_s14 = smov %s1779_s8  ;;  %s2601_s15 = smov %s1660_s17 }
 0x19b   : > { %s2602_s16 = smov %s1664_s18  ;;  %s2603_s17 = smov %s2606_s22 }
 0x19c   : > { %s2604_s18 = smov %s2610_s23  ;;  %17 = sbr.rel (!%p15_p13) target bundleno = 10 (0xa), region = 80 }
 0x1a3   :  { %1302 = vsyncpa [#allocation3], 1 }
 0x1a4   :  { %1304 = vsyncpa [#allocation3 + $0x1], 1 }
 0x1a5   :  { %1305 = vsyncpa [#allocation4], 1 }
 0x1a6   :  { %1307 = vsyncpa [#allocation4 + $0x1], 1 }
 0x1a7   :  { %1308 = vsyncpa [#allocation6], 1 }

</bundles_post_ra>
